<compile_context>
chip_gen: v6e
topology: v6e:2x2x1
jax: 0.10.0
libtpu: 0.0.40
codegen_flags: <defaults>
</compile_context>

<pallas_src>
import math

import jax
import jax.numpy as jnp
from jax.experimental import pallas as pl
from jax.experimental.pallas import tpu as pltpu

_NEG_BIG = -1e30  # finite "-inf": padded rows never produce inf/NaN arithmetic


def _gaussian_kde_kernel(yoff_ref, x_ref, yt_ref, o_ref, m_s, l_s):
    # yoff_ref: (1, TQ)       per-query offset  -0.5*||y_j||^2/bw^2 - Z
    # x_ref   : (NC, M+1)     data chunk with bias column appended
    # yt_ref  : (M+1, TQ)     (y^T / bw^2) with a ones row appended
    # o_ref   : (1, TQ)       lane-dense output row
    # m_s,l_s : (1, TQ)       online-logsumexp running max / running sum
    k = pl.program_id(1)

    @pl.when(k == 0)
    def _():
        m_s[...] = jnp.full_like(m_s, _NEG_BIG)
        l_s[...] = jnp.zeros_like(l_s)

    # Single MXU matmul yields a_ij = (y_j . x_i)/bw^2 - 0.5*||x_i||^2/bw^2
    # (bandwidth scale and data bias are folded into the augmented operands).
    a = jnp.dot(x_ref[...], yt_ref[...], preferred_element_type=jnp.float32)  # (NC, TQ)

    # Online logsumexp over the data (sublane) axis.
    chunk_max = jnp.max(a, axis=0, keepdims=True)         # (1, TQ)
    m_new = jnp.maximum(m_s[...], chunk_max)
    alpha = jnp.exp(m_s[...] - m_new)
    p = jnp.exp(a - m_new)                                 # EUP; padded rows -> 0
    l_s[...] = alpha * l_s[...] + jnp.sum(p, axis=0, keepdims=True)
    m_s[...] = m_new

    @pl.when(k == pl.num_programs(1) - 1)
    def _():
        o_ref[...] = (m_s[...] + jnp.log(l_s[...]) + yoff_ref[...]).astype(o_ref.dtype)


def gaussian_kernel_forward(y, x, bandwidth, *, tq=512, nc=1024):
    """Pallas equivalent of GaussianKernel.forward(y, x). Returns shape (Ny,).

    tq: query-tile width (multiple of 128; keeps output lane-dense / MXU full).
    nc: data-chunk rows streamed per grid step (bounds VMEM independently of N).
    Both are clamped to the (padded) problem size.
    """
    ny, m = y.shape
    n, m2 = x.shape
    assert m == m2, "feature dims must match"

    bw = float(bandwidth)
    inv_bw2 = 1.0 / (bw * bw)
    z = 0.5 * m * math.log(2.0 * math.pi) + m * math.log(bw) + math.log(n)

    y = y.astype(jnp.float32)
    x = x.astype(jnp.float32)

    # ---- tile-size selection --------------------------------------------
    ny_128 = pl.cdiv(ny, 128) * 128
    tq = max(128, min(tq, ny_128))
    if ny_128 // tq < 2 and ny_128 >= 256:
        # Ensure >=2 query tiles so the "parallel" axis can shard across both
        # v7x TensorCores (no-op cost on single-TC v5e/v6e at these sizes).
        tq = max(128, ((ny_128 // 2) // 128) * 128)
    ny_pad = pl.cdiv(ny, tq) * tq

    n_8 = pl.cdiv(n, 8) * 8
    nc = max(8, (min(nc, n_8) // 8) * 8)
    n_pad = pl.cdiv(n, nc) * nc          # n_pad - n < nc -> every chunk has real rows

    # ---- augmented operands (bias + bandwidth folded into the matmul) ----
    # Per-query constant offset (added once, in the finalize step).
    yoff = (-0.5 * inv_bw2) * jnp.sum(y * y, axis=-1) - z              # (ny,)
    yoff_row = jnp.zeros((1, ny_pad), jnp.float32).at[0, :ny].set(yoff)

    # y^T scaled by 1/bw^2 with an appended ones row (carries the data bias).
    y_t = jnp.zeros((m + 1, ny_pad), jnp.float32)
    y_t = y_t.at[:m, :ny].set(y.T * inv_bw2)
    y_t = y_t.at[m, :].set(1.0)

    # Data with appended bias column: -0.5*||x_i||^2/bw^2 for real rows,
    # -1e30 for pad rows so they contribute exp(...) == 0 to the LSE.
    xb = (-0.5 * inv_bw2) * jnp.sum(x * x, axis=-1)                    # (n,)
    x_aug = jnp.zeros((n_pad, m + 1), jnp.float32)
    x_aug = x_aug.at[:n, :m].set(x)
    x_aug = x_aug.at[:, m].set(_NEG_BIG)
    x_aug = x_aug.at[:n, m].set(xb)

    grid = (ny_pad // tq, n_pad // nc)

    out = pl.pallas_call(
        _gaussian_kde_kernel,
        out_shape=jax.ShapeDtypeStruct((1, ny_pad), jnp.float32),
        grid_spec=pltpu.PrefetchScalarGridSpec(
            num_scalar_prefetch=0,
            grid=grid,
            in_specs=[
                pl.BlockSpec((1, tq), lambda i, k: (0, i)),        # query offset row
                pl.BlockSpec((nc, m + 1), lambda i, k: (k, 0)),    # data chunk (+bias col)
                pl.BlockSpec((m + 1, tq), lambda i, k: (0, i)),    # scaled y^T (+ones row)
            ],
            out_specs=pl.BlockSpec((1, tq), lambda i, k: (0, i)),
            scratch_shapes=[
                pltpu.VMEM((1, tq), jnp.float32),                  # running max
                pltpu.VMEM((1, tq), jnp.float32),                  # running sum
            ],
        ),
        compiler_params=pltpu.CompilerParams(
            dimension_semantics=("parallel", "arbitrary"),
            # No vmem_limit override: working set is a few MiB, well under the
            # default scoped VMEM on v5e/v6e/v7x.
        ),
    )(yoff_row, x_aug, y_t)

    return out[0, :ny]


def _reference_forward(y, x, bandwidth):
    """Pure-JAX reference mirroring the PyTorch code (residual form)."""
    yb = y[:, None, :]
    xb = x[None, :, :]
    _, n, m = xb.shape
    resid = yb - xb
    z = (0.5 * m * jnp.log(2.0 * jnp.pi)
         + m * jnp.log(jnp.float32(bandwidth))
         + jnp.log(jnp.float32(n)))
    log_kernel = -0.5 * jnp.sum((resid / bandwidth) ** 2, axis=-1)
    return jax.scipy.special.logsumexp(log_kernel - z, axis=-1)


if __name__ == "__main__":
    key = jax.random.PRNGKey(0)
    k_y, k_x = jax.random.split(key)

    # Small shapes, deliberately not multiples of the tile sizes to exercise
    # padding and the adaptive tile clamping.
    ny, n, m = 300, 600, 32
    bandwidth = 0.7

    x = jax.random.normal(k_x, (n, m), dtype=jnp.float32)   # data set held by GaussianKernel
    y = jax.random.normal(k_y, (ny, m), dtype=jnp.float32)  # query points

    out = gaussian_kernel_forward(y, x, bandwidth)
    out = jax.block_until_ready(out)

    ref = _reference_forward(y, x, bandwidth)
    assert out.shape == (ny,)
    assert jnp.allclose(out, ref, atol=1e-3, rtol=1e-3), (out, ref)

    # TODO(synk): GaussianKernel.sample / .to(device) are host-side utilities, not part
    # of forward(); left untranslated.
    print("KERNEL_OK")
</pallas_src>

<mosaic_0001>
module attributes {stable_mosaic.version = 11 : i64} {
  func.func @_gaussian_kde_kernel(%arg0: i32, %arg1: i32, %arg2: memref<1x128xf32, #tpu.memory_space<vmem>>, %arg3: memref<600x33xf32, #tpu.memory_space<vmem>>, %arg4: memref<33x128xf32, #tpu.memory_space<vmem>>, %arg5: memref<1x128xf32, #tpu.memory_space<vmem>>, %arg6: memref<1x128xf32, #tpu.memory_space<vmem>>, %arg7: memref<1x128xf32, #tpu.memory_space<vmem>>) attributes {dimension_semantics = [#tpu.dimension_semantics<parallel>, #tpu.dimension_semantics<arbitrary>], iteration_bounds = array<i64: 3, 1>, scalar_prefetch = 0 : i64, scratch_operands = 2 : i64, tpu.core_type = #tpu.core_type<tc>, window_params = [{transform_indices = @transform_0, window_bounds = array<i64: 1, 128>}, {transform_indices = @transform_1, window_bounds = array<i64: 600, 33>}, {transform_indices = @transform_2, window_bounds = array<i64: 33, 128>}, {transform_indices = @transform_3, window_bounds = array<i64: 1, 128>}]} {
    %c0_i32 = arith.constant 0 : i32
    %0 = arith.cmpi eq, %arg1, %c0_i32 : i32
    %1 = arith.extui %0 : i1 to i32
    %c0_i32_0 = arith.constant 0 : i32
    %2 = arith.cmpi ne, %1, %c0_i32_0 : i32
    scf.if %2 {
      %cst_18 = arith.constant -1.000000e+30 : f32
      %26 = vector.broadcast %cst_18 : f32 to vector<1x128xf32>
      %c0_19 = arith.constant 0 : index
      %c0_20 = arith.constant 0 : index
      %27 = vector.load %arg6[%c0_19, %c0_20] : memref<1x128xf32, #tpu.memory_space<vmem>>, vector<1x128xf32>
      tpu.vector_store %arg6[%c0_19, %c0_20], %26 {strides = array<i32>} : memref<1x128xf32, #tpu.memory_space<vmem>>, vector<1x128xf32>,
      %cst_21 = arith.constant 0.000000e+00 : f32
      %28 = vector.broadcast %cst_21 : f32 to vector<1x128xf32>
      %c0_22 = arith.constant 0 : index
      %c0_23 = arith.constant 0 : index
      %29 = vector.load %arg7[%c0_22, %c0_23] : memref<1x128xf32, #tpu.memory_space<vmem>>, vector<1x128xf32>
      tpu.vector_store %arg7[%c0_22, %c0_23], %28 {strides = array<i32>} : memref<1x128xf32, #tpu.memory_space<vmem>>, vector<1x128xf32>,
    } else {
    }
    %c0 = arith.constant 0 : index
    %c0_1 = arith.constant 0 : index
    %3 = vector.load %arg3[%c0, %c0_1] : memref<600x33xf32, #tpu.memory_space<vmem>>, vector<600x33xf32>
    %c0_2 = arith.constant 0 : index
    %c0_3 = arith.constant 0 : index
    %4 = vector.load %arg4[%c0_2, %c0_3] : memref<33x128xf32, #tpu.memory_space<vmem>>, vector<33x128xf32>
    %cst = arith.constant dense<0.000000e+00> : vector<600x128xf32>
    %5 = tpu.matmul %3, %4, %cst {dimension_numbers = #tpu.dot_dimension_numbers<[1], [0], [0], [1], [0, 0, 1, 1], [], []>} : vector<600x33xf32>, vector<33x128xf32>, vector<600x128xf32> -> vector<600x128xf32>
    %cst_4 = arith.constant dense<0xFF800000> : vector<128xf32>
    %6 = vector.multi_reduction <maximumf>, %5, %cst_4 [0] : vector<600x128xf32> to vector<128xf32>
    %7 = vector.shape_cast %6 : vector<128xf32> to vector<1x128xf32>
    %c0_5 = arith.constant 0 : index
    %c0_6 = arith.constant 0 : index
    %8 = vector.load %arg6[%c0_5, %c0_6] : memref<1x128xf32, #tpu.memory_space<vmem>>, vector<1x128xf32>
    %9 = arith.maximumf %8, %7 : vector<1x128xf32>
    %c0_7 = arith.constant 0 : index
    %c0_8 = arith.constant 0 : index
    %10 = vector.load %arg6[%c0_7, %c0_8] : memref<1x128xf32, #tpu.memory_space<vmem>>, vector<1x128xf32>
    %11 = arith.subf %10, %9 : vector<1x128xf32>
    %12 = math.exp %11 : vector<1x128xf32>
    %13 = vector.broadcast %9 : vector<1x128xf32> to vector<600x128xf32>
    %14 = arith.subf %5, %13 : vector<600x128xf32>
    %15 = math.exp %14 : vector<600x128xf32>
    %c0_9 = arith.constant 0 : index
    %c0_10 = arith.constant 0 : index
    %16 = vector.load %arg7[%c0_9, %c0_10] : memref<1x128xf32, #tpu.memory_space<vmem>>, vector<1x128xf32>
    %17 = arith.mulf %12, %16 : vector<1x128xf32>
    %cst_11 = arith.constant dense<0.000000e+00> : vector<128xf32>
    %18 = vector.multi_reduction <add>, %15, %cst_11 [0] : vector<600x128xf32> to vector<128xf32>
    %19 = vector.shape_cast %18 : vector<128xf32> to vector<1x128xf32>
    %20 = arith.addf %17, %19 : vector<1x128xf32>
    %c0_12 = arith.constant 0 : index
    %c0_13 = arith.constant 0 : index
    %21 = vector.load %arg7[%c0_12, %c0_13] : memref<1x128xf32, #tpu.memory_space<vmem>>, vector<1x128xf32>
    tpu.vector_store %arg7[%c0_12, %c0_13], %20 {strides = array<i32>} : memref<1x128xf32, #tpu.memory_space<vmem>>, vector<1x128xf32>,
    %c0_14 = arith.constant 0 : index
    %c0_15 = arith.constant 0 : index
    %22 = vector.load %arg6[%c0_14, %c0_15] : memref<1x128xf32, #tpu.memory_space<vmem>>, vector<1x128xf32>
    tpu.vector_store %arg6[%c0_14, %c0_15], %9 {strides = array<i32>} : memref<1x128xf32, #tpu.memory_space<vmem>>, vector<1x128xf32>,
    %c0_i32_16 = arith.constant 0 : i32
    %23 = arith.cmpi eq, %arg1, %c0_i32_16 : i32
    %24 = arith.extui %23 : i1 to i32
    %c0_i32_17 = arith.constant 0 : i32
    %25 = arith.cmpi ne, %24, %c0_i32_17 : i32
    scf.if %25 {
      %c0_18 = arith.constant 0 : index
      %c0_19 = arith.constant 0 : index
      %26 = vector.load %arg6[%c0_18, %c0_19] : memref<1x128xf32, #tpu.memory_space<vmem>>, vector<1x128xf32>
      %c0_20 = arith.constant 0 : index
      %c0_21 = arith.constant 0 : index
      %27 = vector.load %arg7[%c0_20, %c0_21] : memref<1x128xf32, #tpu.memory_space<vmem>>, vector<1x128xf32>
      %28 = math.log %27 : vector<1x128xf32>
      %29 = arith.addf %26, %28 : vector<1x128xf32>
      %c0_22 = arith.constant 0 : index
      %c0_23 = arith.constant 0 : index
      %30 = vector.load %arg2[%c0_22, %c0_23] : memref<1x128xf32, #tpu.memory_space<vmem>>, vector<1x128xf32>
      %31 = arith.addf %29, %30 : vector<1x128xf32>
      %c0_24 = arith.constant 0 : index
      %c0_25 = arith.constant 0 : index
      %32 = vector.load %arg5[%c0_24, %c0_25] : memref<1x128xf32, #tpu.memory_space<vmem>>, vector<1x128xf32>
      tpu.vector_store %arg5[%c0_24, %c0_25], %31 {strides = array<i32>} : memref<1x128xf32, #tpu.memory_space<vmem>>, vector<1x128xf32>,
    } else {
    }
    return
  }
  func.func @transform_0(%arg0: i32, %arg1: i32) -> (i32, i32) {
    %c0_i32 = arith.constant 0 : i32
    %c0_i32_0 = arith.constant 0 : i32
    return %c0_i32, %arg0 : i32, i32
  }
  func.func @transform_1(%arg0: i32, %arg1: i32) -> (i32, i32) {
    %c0_i32 = arith.constant 0 : i32
    %c0_i32_0 = arith.constant 0 : i32
    return %arg1, %c0_i32 : i32, i32
  }
  func.func @transform_2(%arg0: i32, %arg1: i32) -> (i32, i32) {
    %c0_i32 = arith.constant 0 : i32
    %c0_i32_0 = arith.constant 0 : i32
    return %c0_i32, %arg0 : i32, i32
  }
  func.func @transform_3(%arg0: i32, %arg1: i32) -> (i32, i32) {
    %c0_i32 = arith.constant 0 : i32
    %c0_i32_0 = arith.constant 0 : i32
    return %c0_i32, %arg0 : i32, i32
  }
}

</mosaic_0001>

<bundles_post_ra>
// kernel: tpu_custom_call.1
= control target key start
LH: loop header
LB: loop body
LE: loop exit
PB: predicated region body
PF: predicated region fallthrough
CT: control target
= control target key end

     0   :  { %8 = vsyncpa [#allocation6], 0  ;;  %s3259_s0 = inlined_call_operand.vmem [shape: f32[1,384], index: 0, kind: input, shape index: {}]   ;;  %s3260_s1 = inlined_call_operand.vmem [shape: f32[600,33], index: 1, kind: input, shape index: {}]   ;;  %s3261_s2 = inlined_call_operand.vmem [shape: f32[33,384], index: 2, kind: input, shape index: {}]   ;;  %s3262_s3 = inlined_call_operand.hbm [shape: f32[1,384], index: 3, kind: output, shape index: {}]  }
   0x1   :  { %10 = vsyncpa [#allocation6 + $0x1], 0  ;;  %s2268_s12 = smov 0   ;;  %s2270_s13 = smov 0  }
   0x2   :  { %s2272_s14 = smov 0   ;;  %s2274_s15 = smov 0  }
   0x3   :  { %s2276_s16 = smov 0   ;;  %s2278_s17 = smov 0  }
   0x4 LB: > { %s1541_s18 = sadd.s32 4294967295, %s2242_s17   ;;  %s1542_s19 = sadd.s32 4294967294, %s2242_s17   ;;  %s2242_s17 = sphi %s2278_s17, %s16_s17   ;;  %s2238_s16 = sphi %s2276_s16, %s3359_s16   ;;  %s2234_s15 = sphi %s2274_s15, %s3358_s15   ;;  %s2230_s14 = sphi %s2272_s14, %s3357_s14   ;;  %s2226_s13 = sphi %s2270_s13, %s3356_s13   ;;  %s2222_s12 = sphi %s2268_s12, %s3355_s12  }
   0x5   : > { %s28_s20 = sadd.s32 1, %s2238_s16  ;;  %s87_s21 = sadd.s32 1, %s2230_s14 }
   0x6   : > { %p30_p0 = scmp.ge.s32.totalorder %s28_s20, 3  ;;  %p94_p1 = scmp.ne.s32.totalorder %s2230_s14, %s2226_s13 }
   0x7   : > { %p95_p2 = scmp.eq.s32.totalorder %s2242_s17, 0  ;;  %p124_p3 = scmp.eq.s32.totalorder %s1541_s18, 2 }
   0x8   : > { %s3361_s20 = smov (%p30_p0, %s28_s20), 0  ;;  %p129_p6 = scmp.ne.s32.totalorder %s2226_s13, %s2222_s12 }
   0x9   : > { %p96_p4 = por %p95_p2, %p94_p1  ;;  %p2307_p5 = por %p124_p3, %p94_p1 }
   0xa   : > { %s84_s23 = ssub.s32 %s2238_s16, %s3361_s20  ;;  %p130_p8 = scmp.eq.s32.totalorder %s1542_s19, 2 }
   0xb   : > { %p85_p7 = scmp.eq.s32.totalorder %s84_s23, 0  ;;  %p1545_p10 = scmp.ge.s32.totalorder %s2242_s17, 3 }
   0xc   : > { %p2318_p9 = por %p130_p8, %p129_p6 }
   0xd   : > { %s2316_s24 = scalar_select %p85_p7, %s2230_s14, %s87_s21  }
   0xe   : > { %155 = sbr.rel (%p1545_p10) target bundleno = 26 (0x1a), region = 20 }
  0x13   : > { %164 = sbr.rel (!%p96_p4) target bundleno = 26 (0x1a), region = 28  ;;  %s166_s26 = sand.u32 (%p96_p4), 1, %s2230_s14  }
  0x14   : > { %s1546_s27 = sshll.u32 (%p96_p4), %s2238_s16, 3  ;;  %s1952_s28 = smul.u32 (%p96_p4), 40, %s166_s26 }
  0x15   : > { %s170_s4 = scalar_lea.vmem (%p96_p4), %s3261_s2, %s1546_s27 }
  0x16   : > { %v207_v0 = vld [vmem:[%s170_s4] sm:$0xff] (%p96_p4)  ;;  %v209_v1 = vld [vmem:[%s170_s4 + $0x18] sm:$0xff] (%p96_p4)  ;;  %v211_v2 = vld [vmem:[%s170_s4 + $0x30] sm:$0xff] (%p96_p4)  ;;  %s168_s5 = scalar_lea.vmem (%p96_p4), [#allocation4], %s1952_s28 }
  0x17   : > { %v213_v3 = vld [vmem:[%s170_s4 + $0x48] sm:$0xff] (%p96_p4)  ;;  %v215_v4 = vld [vmem:[%s170_s4 + $0x60] sm:$0xff] (%p96_p4)  ;;  %208 = vst [vmem:[%s168_s5] sm:$0xff] (%p96_p4), %v207_v0  ;;  %210 = vst [vmem:[%s168_s5 + $0x8] sm:$0xff] (%p96_p4), %v209_v1 }
  0x18   : > { %212 = vst [vmem:[%s168_s5 + $0x10] sm:$0xff] %v211_v2  ;;  %214 = vst [vmem:[%s168_s5 + $0x18] sm:$0xff] %v213_v3 }
  0x19   : > { %216 = vst [vmem:[%s168_s5 + $0x20] sm:$0xff] %v215_v4 }
  0x1a PF: > { %p1547_p11 = scmp.ge.s32.totalorder %s2242_s17, 1  ;;  %p221_p12 = scmp.lt.s32.totalorder %s2242_s17, 4 }
  0x1c   : > { %p222_p13 = pnand %p1547_p11, %p221_p12 }
  0x1e   : > { %225 = sbr.rel (%p222_p13) target bundleno = 639 (0x27f), region = 66 }
  0x23   : > { %s2331_s6 = sand.u32 1, %s2226_s13   ;;  %v2244_v5 = vmov 0.0   ;;  %vm2245_vm0 = vmmov 0   ;;  %vm579_vm1 = vcmask 1040384   ;;  %v273_v11 = vld [vmem:[%s3260_s1] sm:$0xff]  ;;  %vm353_vm2 = vcmask 269312  }
  0x24   : > { %1707 = vmatprep.subr.mxu0 %v2244_v5  ;;  %272 = vst [vmem:[#allocation3] sm:$0x1] %v2244_v5  ;;  %s1953_s7 = smul.u32 40, %s2331_s6  ;;  %1717 = vmatprep.mubr.msk.f32.mxu0 %vm2245_vm0, %v2244_v5  ;;  %v311_v12 = vld [vmem:[%s3260_s1 + $0x130] sm:$0xff]  ;;  %v274_v13 = vld [vmem:[%s3260_s1 + $0x8] sm:$0xff]  ;;  %v312_v14 = vld [vmem:[%s3260_s1 + $0x138] sm:$0xff] }
  0x25   : > { %1942 = vmatprep.subr.mxu1 %v2244_v5  ;;  %1831 = vmatprep.mubr.msk.f32.mxu1 %vm2245_vm0, %v2244_v5  ;;  %v275_v15 = vld [vmem:[%s3260_s1 + $0x10] sm:$0xff]  ;;  %v313_v16 = vld [vmem:[%s3260_s1 + $0x140] sm:$0xff]  ;;  %v276_v17 = vld [vmem:[%s3260_s1 + $0x18] sm:$0xff]  ;;  %p258_p0 = scmp.lt.s32.totalorder %s2234_s15, 2  ;;  %s1624_s29 = sshll.u32 %s2234_s15, 4 }
  0x26   : > { %s230_s8 = scalar_lea.vmem [#allocation4], %s1953_s7  ;;  %v314_v18 = vld [vmem:[%s3260_s1 + $0x148] sm:$0xff]  ;;  %v277_v19 = vld [vmem:[%s3260_s1 + $0x20] sm:$0xff]  ;;  %v315_v20 = vld [vmem:[%s3260_s1 + $0x150] sm:$0xff]  ;;  %s257_s30 = scalar_lea.vmem [#allocation5], %s2331_s6 }
  0x27   : > { %v352_v6 = vld [vmem:[%s230_s8 + $0x20] sm:$0x1]  ;;  %v351_v7 = vld [vmem:[%s230_s8 + $0x18] sm:$0xff]  ;;  %v350_v8 = vld [vmem:[%s230_s8 + $0x10] sm:$0xff]  ;;  %s259_s23 = scalar_select %p258_p0, %s2234_s15, 2 }
  0x28   : > { %1708 = vmatpush3.msk.msra.mxu0 %vm579_vm1, %v352_v6  ;;  %1947 = vmatpush3.msk.msra.mxu1 %vm579_vm1, %v352_v6  ;;  %v349_v9 = vld [vmem:[%s230_s8 + $0x8] sm:$0xff]  ;;  %v348_v10 = vld [vmem:[%s230_s8] sm:$0xff]  ;;  %s1448_s4 = sshll.u32 %s257_s30, 4  ;;  %s1446_s8 = scalar_lea.hbm %s3262_s3, %s1624_s29  ;;  %s1449_s4 = int_to_ptr.vmem [resolvable:$true] %s1448_s4 }
  0x29   : > { %1709 = vmatprep.subr.mxu0 %v2244_v5  ;;  %1943 = vmatprep.subr.mxu1 %v2244_v5  ;;  %v278_v21 = vld [vmem:[%s3260_s1 + $0x28] sm:$0xff]  ;;  %v316_v22 = vld [vmem:[%s3260_s1 + $0x158] sm:$0xff]  ;;  %v279_v23 = vld [vmem:[%s3260_s1 + $0x30] sm:$0xff]  ;;  %s260_s28 = scalar_lea.vmem %s3259_s0, %s259_s23  ;;  %s1436_s9 = scalar_lea.sflag [#allocation6], %s2331_s6 }
  0x2a   : > { %1710 = vmatpush3.msra.mxu0 %v351_v7  ;;  %1948 = vmatpush3.msra.mxu1 %v351_v7  ;;  %v317_v24 = vld [vmem:[%s3260_s1 + $0x160] sm:$0xff]  ;;  %v280_v25 = vld [vmem:[%s3260_s1 + $0x38] sm:$0xff]  ;;  %v318_v26 = vld [vmem:[%s3260_s1 + $0x168] sm:$0xff]  ;;  %s2166_s10 = scalar_lea.vmem %s1449_s4, 16  ;;  %s2247_s11 = smov [#allocation5]  }
  0x2b   : > { %1711 = vmatprep.subr.mxu0 %v2244_v5  ;;  %1944 = vmatprep.subr.mxu1 %v2244_v5  ;;  %v281_v27 = vld [vmem:[%s3260_s1 + $0x40] sm:$0xff]  ;;  %v319_v28 = vld [vmem:[%s3260_s1 + $0x170] sm:$0xff]  ;;  %v282_v29 = vld [vmem:[%s3260_s1 + $0x48] sm:$0xff]  ;;  %p2167_p1 = scmp.ne.s32.totalorder %s1449_s4, %s2166_s10  ;;  %s2170_s18 = sshll.u32 %s2247_s11, 4  ;;  %s2171_s18 = int_to_ptr.vmem [resolvable:$false] %s2170_s18 }
  0x2c   : > { %1712 = vmatpush3.msra.mxu0 %v350_v8  ;;  %1949 = vmatpush3.msra.mxu1 %v350_v8  ;;  %v320_v30 = vld [vmem:[%s3260_s1 + $0x178] sm:$0xff]  ;;  %v283_v31 = vld [vmem:[%s3260_s1 + $0x50] sm:$0xff]  ;;  %v321_v32 = vld [vmem:[%s3260_s1 + $0x180] sm:$0xff]  ;;  %s2172_s15 = scalar_lea.vmem %s2171_s18, 32  ;;  %p2173_p4 = scmp.lt.s32.totalorder %s1449_s4, %s2171_s18 }
  0x2d   : > { %1713 = vmatprep.subr.mxu0 %v2244_v5  ;;  %1945 = vmatprep.subr.mxu1 %v2244_v5  ;;  %v284_v33 = vld [vmem:[%s3260_s1 + $0x58] sm:$0xff]  ;;  %v322_v34 = vld [vmem:[%s3260_s1 + $0x188] sm:$0xff]  ;;  %v285_v35 = vld [vmem:[%s3260_s1 + $0x60] sm:$0xff]  ;;  %p2168_p2 = pnand %p2167_p1, %p2307_p5  ;;  %p2174_p6 = scmp.lt.s32.totalorder %s2172_s15, %s2166_s10 }
  0x2e   : > { %1714 = vmatpush3.msra.mxu0 %v349_v9  ;;  %1950 = vmatpush3.msra.mxu1 %v349_v9  ;;  %v323_v36 = vld [vmem:[%s3260_s1 + $0x190] sm:$0xff]  ;;  %v286_v37 = vld [vmem:[%s3260_s1 + $0x68] sm:$0xff]  ;;  %v324_v38 = vld [vmem:[%s3260_s1 + $0x198] sm:$0xff] }
  0x2f   : > { %1715 = vmatprep.subr.mxu0 %v2244_v5  ;;  %1946 = vmatprep.subr.mxu1 %v2244_v5  ;;  %v287_v39 = vld [vmem:[%s3260_s1 + $0x70] sm:$0xff]  ;;  %v325_v40 = vld [vmem:[%s3260_s1 + $0x1a0] sm:$0xff]  ;;  %v288_v41 = vld [vmem:[%s3260_s1 + $0x78] sm:$0xff]  ;;  %p2169_p3 = pneg %p2168_p2  ;;  %p2175_p7 = por %p2174_p6, %p2173_p4 }
  0x30   : > { %1716 = vmatpush3.msra.mxu0 %v348_v10  ;;  %1951 = vmatpush3.msra.mxu1 %v348_v10  ;;  %v326_v42 = vld [vmem:[%s3260_s1 + $0x1a8] sm:$0xff]  ;;  %v289_v43 = vld [vmem:[%s3260_s1 + $0x80] sm:$0xff]  ;;  %v327_v44 = vld [vmem:[%s3260_s1 + $0x1b0] sm:$0xff] }
  0x31   : > { %1718 = vmatmul.mubr.msk.f32.vlgmr.msra.gmra.mxu0 %vm353_vm2, %v273_v11  ;;  %1832 = vmatmul.mubr.msk.f32.vlgmr.msra.gmra.mxu1 %vm353_vm2, %v311_v12  ;;  %v290_v45 = vld [vmem:[%s3260_s1 + $0x88] sm:$0xff]  ;;  %v328_v46 = vld [vmem:[%s3260_s1 + $0x1b8] sm:$0xff]  ;;  %v291_v47 = vld [vmem:[%s3260_s1 + $0x90] sm:$0xff]  ;;  %p2176_p8 = pnand %p2175_p7, %p2169_p3 }
  0x32   : > { %1720 = vmatprep.mubr.msk.f32.mxu0 %vm2245_vm0, %v2244_v5  ;;  %1834 = vmatprep.mubr.msk.f32.mxu1 %vm2245_vm0, %v2244_v5  ;;  %v329_v48 = vld [vmem:[%s3260_s1 + $0x1c0] sm:$0xff]  ;;  %v292_v49 = vld [vmem:[%s3260_s1 + $0x98] sm:$0xff]  ;;  %v330_v50 = vld [vmem:[%s3260_s1 + $0x1c8] sm:$0xff] }
  0x33   : > { %v293_v51 = vld [vmem:[%s3260_s1 + $0xa0] sm:$0xff]  ;;  %v331_v52 = vld [vmem:[%s3260_s1 + $0x1d0] sm:$0xff]  ;;  %v294_v53 = vld [vmem:[%s3260_s1 + $0xa8] sm:$0xff] }
  0x34   : > { %v332_v54 = vld [vmem:[%s3260_s1 + $0x1d8] sm:$0xff]  ;;  %v295_v55 = vld [vmem:[%s3260_s1 + $0xb0] sm:$0xff]  ;;  %v333_v56 = vld [vmem:[%s3260_s1 + $0x1e0] sm:$0xff] }
  0x35   : > { %1721 = vmatmul.mubr.msk.f32.gmra.mxu0 %vm353_vm2, %v274_v13  ;;  %1835 = vmatmul.mubr.msk.f32.gmra.mxu1 %vm353_vm2, %v312_v14  ;;  %v296_v57 = vld [vmem:[%s3260_s1 + $0xb8] sm:$0xff]  ;;  %v334_v58 = vld [vmem:[%s3260_s1 + $0x1e8] sm:$0xff]  ;;  %v297_v59 = vld [vmem:[%s3260_s1 + $0xc0] sm:$0xff] }
  0x36   : > { %1723 = vmatprep.mubr.msk.f32.mxu0 %vm2245_vm0, %v2244_v5  ;;  %1837 = vmatprep.mubr.msk.f32.mxu1 %vm2245_vm0, %v2244_v5  ;;  %v335_v60 = vld [vmem:[%s3260_s1 + $0x1f0] sm:$0xff]  ;;  %v298_v61 = vld [vmem:[%s3260_s1 + $0xc8] sm:$0xff]  ;;  %v336_v62 = vld [vmem:[%s3260_s1 + $0x1f8] sm:$0xff] }
  0x37   : > { %v299_v63 = vld [vmem:[%s3260_s1 + $0xd0] sm:$0xff]  ;;  %v337_v0 = vld [vmem:[%s3260_s1 + $0x200] sm:$0xff]  ;;  %v300_v1 = vld [vmem:[%s3260_s1 + $0xd8] sm:$0xff] }
  0x38   : > { %v338_v2 = vld [vmem:[%s3260_s1 + $0x208] sm:$0xff]  ;;  %v301_v3 = vld [vmem:[%s3260_s1 + $0xe0] sm:$0xff]  ;;  %v339_v4 = vld [vmem:[%s3260_s1 + $0x210] sm:$0xff] }
  0x39   : > { %1724 = vmatmul.mubr.msk.f32.gmra.mxu0 %vm353_vm2, %v275_v15  ;;  %1838 = vmatmul.mubr.msk.f32.gmra.mxu1 %vm353_vm2, %v313_v16  ;;  %v302_v6 = vld [vmem:[%s3260_s1 + $0xe8] sm:$0xff]  ;;  %v340_v7 = vld [vmem:[%s3260_s1 + $0x218] sm:$0xff]  ;;  %v303_v8 = vld [vmem:[%s3260_s1 + $0xf0] sm:$0xff] }
  0x3a   : > { %1726 = vmatprep.mubr.msk.f32.mxu0 %vm2245_vm0, %v2244_v5  ;;  %1840 = vmatprep.mubr.msk.f32.mxu1 %vm2245_vm0, %v2244_v5  ;;  %v341_v9 = vld [vmem:[%s3260_s1 + $0x220] sm:$0xff]  ;;  %v304_v10 = vld [vmem:[%s3260_s1 + $0xf8] sm:$0xff]  ;;  %v342_v11 = vld [vmem:[%s3260_s1 + $0x228] sm:$0xff] }
  0x3b   : > { %v305_v12 = vld [vmem:[%s3260_s1 + $0x100] sm:$0xff]  ;;  %v343_v13 = vld [vmem:[%s3260_s1 + $0x230] sm:$0xff]  ;;  %v306_v14 = vld [vmem:[%s3260_s1 + $0x108] sm:$0xff] }
  0x3c   : > { %v344_v15 = vld [vmem:[%s3260_s1 + $0x238] sm:$0xff]  ;;  %v307_v16 = vld [vmem:[%s3260_s1 + $0x110] sm:$0xff] }
  0x3d   : > { %1727 = vmatmul.mubr.msk.f32.gmra.mxu0 %vm353_vm2, %v276_v17  ;;  %1841 = vmatmul.mubr.msk.f32.gmra.mxu1 %vm353_vm2, %v314_v18  ;;  %v345_v17 = vld [vmem:[%s3260_s1 + $0x240] sm:$0xff]  ;;  %v308_v18 = vld [vmem:[%s3260_s1 + $0x118] sm:$0xff] }
  0x3e   : > { %1729 = vmatprep.mubr.msk.f32.mxu0 %vm2245_vm0, %v2244_v5  ;;  %1843 = vmatprep.mubr.msk.f32.mxu1 %vm2245_vm0, %v2244_v5 }
  0x41   : > { %1730 = vmatmul.mubr.msk.f32.gmra.mxu0 %vm353_vm2, %v277_v19  ;;  %1844 = vmatmul.mubr.msk.f32.gmra.mxu1 %vm353_vm2, %v315_v20  ;;  %v346_v19 = vld [vmem:[%s3260_s1 + $0x248] sm:$0xff]  ;;  %v309_v20 = vld [vmem:[%s3260_s1 + $0x120] sm:$0xff] }
  0x42   : > { %1732 = vmatprep.mubr.msk.f32.mxu0 %vm2245_vm0, %v2244_v5  ;;  %1846 = vmatprep.mubr.msk.f32.mxu1 %vm2245_vm0, %v2244_v5 }
  0x45   : > { %1733 = vmatmul.mubr.msk.f32.gmra.mxu0 %vm353_vm2, %v278_v21  ;;  %1847 = vmatmul.mubr.msk.f32.gmra.mxu1 %vm353_vm2, %v316_v22  ;;  %v347_v21 = vld [vmem:[%s3260_s1 + $0x250] sm:$0xff]  ;;  %v310_v22 = vld [vmem:[%s3260_s1 + $0x128] sm:$0xff] }
  0x46   : > { %1735 = vmatprep.mubr.msk.f32.mxu0 %vm2245_vm0, %v2244_v5  ;;  %1849 = vmatprep.mubr.msk.f32.mxu1 %vm2245_vm0, %v2244_v5 }
  0x49   : > { %1736 = vmatmul.mubr.msk.f32.gmra.mxu0 %vm353_vm2, %v279_v23  ;;  %1850 = vmatmul.mubr.msk.f32.gmra.mxu1 %vm353_vm2, %v317_v24 }
  0x4a   : > { %1738 = vmatprep.mubr.msk.f32.mxu0 %vm2245_vm0, %v2244_v5  ;;  %1852 = vmatprep.mubr.msk.f32.mxu1 %vm2245_vm0, %v2244_v5 }
  0x4d   : > { %1739 = vmatmul.mubr.msk.f32.gmra.mxu0 %vm353_vm2, %v280_v25  ;;  %1853 = vmatmul.mubr.msk.f32.gmra.mxu1 %vm353_vm2, %v318_v26 }
  0x4e   : > { %1741 = vmatprep.mubr.msk.f32.mxu0 %vm2245_vm0, %v2244_v5  ;;  %1855 = vmatprep.mubr.msk.f32.mxu1 %vm2245_vm0, %v2244_v5 }
  0x51   : > { %1742 = vmatmul.mubr.msk.f32.gmra.mxu0 %vm353_vm2, %v281_v27  ;;  %1856 = vmatmul.mubr.msk.f32.gmra.mxu1 %vm353_vm2, %v319_v28 }
  0x52   : > { %1744 = vmatprep.mubr.msk.f32.mxu0 %vm2245_vm0, %v2244_v5  ;;  %1858 = vmatprep.mubr.msk.f32.mxu1 %vm2245_vm0, %v2244_v5 }
  0x55   : > { %1745 = vmatmul.mubr.msk.f32.gmra.mxu0 %vm353_vm2, %v282_v29  ;;  %1859 = vmatmul.mubr.msk.f32.gmra.mxu1 %vm353_vm2, %v320_v30 }
  0x56   : > { %1747 = vmatprep.mubr.msk.f32.mxu0 %vm2245_vm0, %v2244_v5  ;;  %1861 = vmatprep.mubr.msk.f32.mxu1 %vm2245_vm0, %v2244_v5 }
  0x59   : > { %1748 = vmatmul.mubr.msk.f32.gmra.mxu0 %vm353_vm2, %v283_v31  ;;  %1862 = vmatmul.mubr.msk.f32.gmra.mxu1 %vm353_vm2, %v321_v32 }
  0x5a   : > { %1750 = vmatprep.mubr.msk.f32.mxu0 %vm2245_vm0, %v2244_v5  ;;  %1864 = vmatprep.mubr.msk.f32.mxu1 %vm2245_vm0, %v2244_v5 }
  0x5d   : > { %1751 = vmatmul.mubr.msk.f32.gmra.mxu0 %vm353_vm2, %v284_v33  ;;  %1865 = vmatmul.mubr.msk.f32.gmra.mxu1 %vm353_vm2, %v322_v34 }
  0x5e   : > { %1753 = vmatprep.mubr.msk.f32.mxu0 %vm2245_vm0, %v2244_v5  ;;  %1867 = vmatprep.mubr.msk.f32.mxu1 %vm2245_vm0, %v2244_v5 }
  0x61   : > { %1754 = vmatmul.mubr.msk.f32.gmra.mxu0 %vm353_vm2, %v285_v35  ;;  %1868 = vmatmul.mubr.msk.f32.gmra.mxu1 %vm353_vm2, %v323_v36 }
  0x62   : > { %1756 = vmatprep.mubr.msk.f32.mxu0 %vm2245_vm0, %v2244_v5  ;;  %1870 = vmatprep.mubr.msk.f32.mxu1 %vm2245_vm0, %v2244_v5 }
  0x65   : > { %1757 = vmatmul.mubr.msk.f32.gmra.mxu0 %vm353_vm2, %v286_v37  ;;  %1871 = vmatmul.mubr.msk.f32.gmra.mxu1 %vm353_vm2, %v324_v38 }
  0x66   : > { %1759 = vmatprep.mubr.msk.f32.mxu0 %vm2245_vm0, %v2244_v5  ;;  %1873 = vmatprep.mubr.msk.f32.mxu1 %vm2245_vm0, %v2244_v5 }
  0x69   : > { %1760 = vmatmul.mubr.msk.f32.gmra.mxu0 %vm353_vm2, %v287_v39  ;;  %1874 = vmatmul.mubr.msk.f32.gmra.mxu1 %vm353_vm2, %v325_v40 }
  0x6a   : > { %1762 = vmatprep.mubr.msk.f32.mxu0 %vm2245_vm0, %v2244_v5  ;;  %1876 = vmatprep.mubr.msk.f32.mxu1 %vm2245_vm0, %v2244_v5 }
  0x6d   : > { %1763 = vmatmul.mubr.msk.f32.gmra.mxu0 %vm353_vm2, %v288_v41  ;;  %1877 = vmatmul.mubr.msk.f32.gmra.mxu1 %vm353_vm2, %v326_v42 }
  0x6e   : > { %1765 = vmatprep.mubr.msk.f32.mxu0 %vm2245_vm0, %v2244_v5  ;;  %1879 = vmatprep.mubr.msk.f32.mxu1 %vm2245_vm0, %v2244_v5 }
  0x71   : > { %1766 = vmatmul.mubr.msk.f32.gmra.mxu0 %vm353_vm2, %v289_v43  ;;  %1880 = vmatmul.mubr.msk.f32.gmra.mxu1 %vm353_vm2, %v327_v44 }
  0x72   : > { %1768 = vmatprep.mubr.msk.f32.mxu0 %vm2245_vm0, %v2244_v5  ;;  %1882 = vmatprep.mubr.msk.f32.mxu1 %vm2245_vm0, %v2244_v5 }
  0x75   : > { %1769 = vmatmul.mubr.msk.f32.gmra.mxu0 %vm353_vm2, %v290_v45  ;;  %1883 = vmatmul.mubr.msk.f32.gmra.mxu1 %vm353_vm2, %v328_v46 }
  0x76   : > { %1771 = vmatprep.mubr.msk.f32.mxu0 %vm2245_vm0, %v2244_v5  ;;  %1885 = vmatprep.mubr.msk.f32.mxu1 %vm2245_vm0, %v2244_v5 }
  0x79   : > { %1772 = vmatmul.mubr.msk.f32.gmra.mxu0 %vm353_vm2, %v291_v47  ;;  %1886 = vmatmul.mubr.msk.f32.gmra.mxu1 %vm353_vm2, %v329_v48 }
  0x7a   : > { %1774 = vmatprep.mubr.msk.f32.mxu0 %vm2245_vm0, %v2244_v5  ;;  %1888 = vmatprep.mubr.msk.f32.mxu1 %vm2245_vm0, %v2244_v5 }
  0x7d   : > { %1775 = vmatmul.mubr.msk.f32.gmra.mxu0 %vm353_vm2, %v292_v49  ;;  %1889 = vmatmul.mubr.msk.f32.gmra.mxu1 %vm353_vm2, %v330_v50 }
  0x7e   : > { %1777 = vmatprep.mubr.msk.f32.mxu0 %vm2245_vm0, %v2244_v5  ;;  %1891 = vmatprep.mubr.msk.f32.mxu1 %vm2245_vm0, %v2244_v5 }
  0x81   : > { %1778 = vmatmul.mubr.msk.f32.gmra.mxu0 %vm353_vm2, %v293_v51  ;;  %1892 = vmatmul.mubr.msk.f32.gmra.mxu1 %vm353_vm2, %v331_v52  ;;  %v2246_v52 = vmov -1e+30  }
  0x82   : > { %1780 = vmatprep.mubr.msk.f32.mxu0 %vm2245_vm0, %v2244_v5  ;;  %1894 = vmatprep.mubr.msk.f32.mxu1 %vm2245_vm0, %v2244_v5  ;;  %271 = vst [vmem:[#allocation2] sm:$0x1] %v2246_v52 }
  0x85   : > { %1781 = vmatmul.mubr.msk.f32.gmra.mxu0 %vm353_vm2, %v294_v53  ;;  %1895 = vmatmul.mubr.msk.f32.gmra.mxu1 %vm353_vm2, %v332_v54 }
  0x86   : > { %1783 = vmatprep.mubr.msk.f32.mxu0 %vm2245_vm0, %v2244_v5  ;;  %1897 = vmatprep.mubr.msk.f32.mxu1 %vm2245_vm0, %v2244_v5 }
  0x89   : > { %1784 = vmatmul.mubr.msk.f32.gmra.mxu0 %vm353_vm2, %v295_v55  ;;  %1898 = vmatmul.mubr.msk.f32.gmra.mxu1 %vm353_vm2, %v333_v56 }
  0x8a   : > { %1786 = vmatprep.mubr.msk.f32.mxu0 %vm2245_vm0, %v2244_v5  ;;  %1900 = vmatprep.mubr.msk.f32.mxu1 %vm2245_vm0, %v2244_v5 }
  0x8d   : > { %1787 = vmatmul.mubr.msk.f32.gmra.mxu0 %vm353_vm2, %v296_v57  ;;  %1901 = vmatmul.mubr.msk.f32.gmra.mxu1 %vm353_vm2, %v334_v58 }
  0x8e   : > { %1789 = vmatprep.mubr.msk.f32.mxu0 %vm2245_vm0, %v2244_v5  ;;  %1903 = vmatprep.mubr.msk.f32.mxu1 %vm2245_vm0, %v2244_v5 }
  0x91   : > { %1790 = vmatmul.mubr.msk.f32.gmra.mxu0 %vm353_vm2, %v297_v59  ;;  %1904 = vmatmul.mubr.msk.f32.gmra.mxu1 %vm353_vm2, %v335_v60 }
  0x92   : > { %1792 = vmatprep.mubr.msk.f32.mxu0 %vm2245_vm0, %v2244_v5  ;;  %1906 = vmatprep.mubr.msk.f32.mxu1 %vm2245_vm0, %v2244_v5 }
  0x95   : > { %1793 = vmatmul.mubr.msk.f32.gmra.mxu0 %vm353_vm2, %v298_v61  ;;  %1907 = vmatmul.mubr.msk.f32.gmra.mxu1 %vm353_vm2, %v336_v62 }
  0x96   : > { %1795 = vmatprep.mubr.msk.f32.mxu0 %vm2245_vm0, %v2244_v5  ;;  %1909 = vmatprep.mubr.msk.f32.mxu1 %vm2245_vm0, %v2244_v5 }
  0x99   : > { %1796 = vmatmul.mubr.msk.f32.gmra.mxu0 %vm353_vm2, %v299_v63  ;;  %1910 = vmatmul.mubr.msk.f32.gmra.mxu1 %vm353_vm2, %v337_v0 }
  0x9a   : > { %1798 = vmatprep.mubr.msk.f32.mxu0 %vm2245_vm0, %v2244_v5  ;;  %1912 = vmatprep.mubr.msk.f32.mxu1 %vm2245_vm0, %v2244_v5 }
  0x9d   : > { %1799 = vmatmul.mubr.msk.f32.gmra.mxu0 %vm353_vm2, %v300_v1  ;;  %1913 = vmatmul.mubr.msk.f32.gmra.mxu1 %vm353_vm2, %v338_v2 }
  0x9e   : > { %1801 = vmatprep.mubr.msk.f32.mxu0 %vm2245_vm0, %v2244_v5  ;;  %1915 = vmatprep.mubr.msk.f32.mxu1 %vm2245_vm0, %v2244_v5 }
  0xa1   : > { %1802 = vmatmul.mubr.msk.f32.gmra.mxu0 %vm353_vm2, %v301_v3  ;;  %1916 = vmatmul.mubr.msk.f32.gmra.mxu1 %vm353_vm2, %v339_v4 }
  0xa2   : > { %1804 = vmatprep.mubr.msk.f32.mxu0 %vm2245_vm0, %v2244_v5  ;;  %1918 = vmatprep.mubr.msk.f32.mxu1 %vm2245_vm0, %v2244_v5 }
  0xa5   : > { %1805 = vmatmul.mubr.msk.f32.gmra.mxu0 %vm353_vm2, %v302_v6  ;;  %1919 = vmatmul.mubr.msk.f32.gmra.mxu1 %vm353_vm2, %v340_v7 }
  0xa6   : > { %1807 = vmatprep.mubr.msk.f32.mxu0 %vm2245_vm0, %v2244_v5  ;;  %1921 = vmatprep.mubr.msk.f32.mxu1 %vm2245_vm0, %v2244_v5 }
  0xa9   : > { %1808 = vmatmul.mubr.msk.f32.gmra.mxu0 %vm353_vm2, %v303_v8  ;;  %1922 = vmatmul.mubr.msk.f32.gmra.mxu1 %vm353_vm2, %v341_v9 }
  0xaa   : > { %1810 = vmatprep.mubr.msk.f32.mxu0 %vm2245_vm0, %v2244_v5  ;;  %1924 = vmatprep.mubr.msk.f32.mxu1 %vm2245_vm0, %v2244_v5 }
  0xad   : > { %1811 = vmatmul.mubr.msk.f32.gmra.mxu0 %vm353_vm2, %v304_v10  ;;  %1925 = vmatmul.mubr.msk.f32.gmra.mxu1 %vm353_vm2, %v342_v11 }
  0xae   : > { %1813 = vmatprep.mubr.msk.f32.mxu0 %vm2245_vm0, %v2244_v5  ;;  %1927 = vmatprep.mubr.msk.f32.mxu1 %vm2245_vm0, %v2244_v5 }
  0xb1   : > { %1814 = vmatmul.mubr.msk.f32.gmra.mxu0 %vm353_vm2, %v305_v12  ;;  %1928 = vmatmul.mubr.msk.f32.gmra.mxu1 %vm353_vm2, %v343_v13 }
  0xb2   : > { %1816 = vmatprep.mubr.msk.f32.mxu0 %vm2245_vm0, %v2244_v5  ;;  %1930 = vmatprep.mubr.msk.f32.mxu1 %vm2245_vm0, %v2244_v5 }
  0xb5   : > { %1817 = vmatmul.mubr.msk.f32.gmra.mxu0 %vm353_vm2, %v306_v14  ;;  %1931 = vmatmul.mubr.msk.f32.gmra.mxu1 %vm353_vm2, %v344_v15 }
  0xb6   : > { %1819 = vmatprep.mubr.msk.f32.mxu0 %vm2245_vm0, %v2244_v5  ;;  %1933 = vmatprep.mubr.msk.f32.mxu1 %vm2245_vm0, %v2244_v5 }
  0xb9   : > { %1820 = vmatmul.mubr.msk.f32.gmra.mxu0 %vm353_vm2, %v307_v16  ;;  %1934 = vmatmul.mubr.msk.f32.gmra.mxu1 %vm353_vm2, %v345_v17 }
  0xba   : > { %1822 = vmatprep.mubr.msk.f32.mxu0 %vm2245_vm0, %v2244_v5  ;;  %1936 = vmatprep.mubr.msk.f32.mxu1 %vm2245_vm0, %v2244_v5 }
  0xbd   : > { %1823 = vmatmul.mubr.msk.f32.gmra.mxu0 %vm353_vm2, %v308_v18  ;;  %1937 = vmatmul.mubr.msk.f32.gmra.mxu1 %vm353_vm2, %v346_v19 }
  0xbe   : > { %1825 = vmatprep.mubr.msk.f32.mxu0 %vm2245_vm0, %v2244_v5  ;;  %1939 = vmatprep.mubr.msk.f32.mxu1 %vm2245_vm0, %v2244_v5 }
  0xc1   : > { %1826 = vmatmul.mubr.msk.f32.gmra.mxu0 %vm353_vm2, %v309_v20  ;;  %1940 = vmatmul.mubr.msk.f32.gmra.mxu1 %vm353_vm2, %v347_v21 }
  0xc2   : > { %1828 = vmatprep.mubr.msk.f32.mxu0 %vm2245_vm0, %v2244_v5 }
  0xc5   : > { %1829 = vmatmul.mubr.msk.f32.gmra.mxu0 %vm353_vm2, %v310_v22 }
  0xf1   : > { %v2795_v23 = vpop.f32.mrf.mxu0  ;;  %v2797_v24 = vpop.f32.mrf.mxu1 }
  0xf3   : > { %v1719_v25 = vpop.f32.mrf.mxu0  ;;  %v1833_v26 = vpop.f32.mrf.mxu1 }
  0xf5   : > { %v2799_v27 = vpop.f32.mrf.mxu0  ;;  %v2801_v28 = vpop.f32.mrf.mxu1 }
  0xf7   : > { %v1722_v29 = vpop.f32.mrf.mxu0  ;;  %v1836_v30 = vpop.f32.mrf.mxu1 }
  0xf9   : > { %v2803_v31 = vpop.f32.mrf.mxu0  ;;  %v2805_v5 = vpop.f32.mrf.mxu1 }
  0xfb   : > { %v1725_v32 = vpop.f32.mrf.mxu0  ;;  %v1839_v33 = vpop.f32.mrf.mxu1 }
  0xfd   : > { %v2807_v34 = vpop.f32.mrf.mxu0  ;;  %v2809_v35 = vpop.f32.mrf.mxu1 }
  0xff   : > { %v1728_v36 = vpop.f32.mrf.mxu0  ;;  %v1842_v37 = vpop.f32.mrf.mxu1 }
 0x101   : > { %v2811_v38 = vpop.f32.mrf.mxu0  ;;  %v2813_v39 = vpop.f32.mrf.mxu1 }
 0x102   : > { %3293 = vst [vmem:[#allocation8_spill] sm:$0xff] %v2813_v39 }
 0x103   : > { %v1731_v40 = vpop.f32.mrf.mxu0  ;;  %v1845_v41 = vpop.f32.mrf.mxu1 }
 0x104   : > { %v1057_v41 = vmax.f32 %v2801_v28, %v2797_v24 }
 0x105   : > { %v2815_v42 = vpop.f32.mrf.mxu0  ;;  %v2817_v43 = vpop.f32.mrf.mxu1 }
 0x106   : > { %3294 = vst [vmem:[#allocation9_spill] sm:$0xff] %v2817_v43  ;;  %v1061_v52 = vmax.f32 %v1057_v41, %v2805_v5 }
 0x107   : > { %v1734_v44 = vpop.f32.mrf.mxu0  ;;  %v1848_v45 = vpop.f32.mrf.mxu1 }
 0x109   : > { %v2819_v46 = vpop.f32.mrf.mxu0  ;;  %v2821_v47 = vpop.f32.mrf.mxu1 }
 0x10a   : > { %3295 = vst [vmem:[#allocation10_spill] sm:$0xff] %v2821_v47 }
 0x10b   : > { %v1737_v48 = vpop.f32.mrf.mxu0  ;;  %v1851_v49 = vpop.f32.mrf.mxu1 }
 0x10d   : > { %v2823_v50 = vpop.f32.mrf.mxu0  ;;  %v2825_v51 = vpop.f32.mrf.mxu1 }
 0x10e   : > { %3296 = vst [vmem:[#allocation11_spill] sm:$0xff] %v2825_v51 }
 0x10f   : > { %v1740_v53 = vpop.f32.mrf.mxu0  ;;  %v1854_v54 = vpop.f32.mrf.mxu1 }
 0x111   : > { %v2827_v55 = vpop.f32.mrf.mxu0  ;;  %v2829_v56 = vpop.f32.mrf.mxu1 }
 0x112   : > { %3297 = vst [vmem:[#allocation12_spill] sm:$0xff] %v2829_v56 }
 0x113   : > { %v1743_v57 = vpop.f32.mrf.mxu0  ;;  %v1857_v58 = vpop.f32.mrf.mxu1 }
 0x115   : > { %v2831_v59 = vpop.f32.mrf.mxu0  ;;  %v2833_v60 = vpop.f32.mrf.mxu1 }
 0x116   : > { %3298 = vst [vmem:[#allocation13_spill] sm:$0xff] %v2833_v60 }
 0x117   : > { %v1746_v61 = vpop.f32.mrf.mxu0  ;;  %v1860_v62 = vpop.f32.mrf.mxu1 }
 0x118   : > { %v1065_v61 = vmax.f32 %v1061_v52, %v2809_v35 }
 0x119   : > { %v2835_v63 = vpop.f32.mrf.mxu0  ;;  %v2837_v0 = vpop.f32.mrf.mxu1 }
 0x11a   : > { %3299 = vst [vmem:[#allocation14_spill] sm:$0xff] %v2837_v0 }
 0x11b   : > { %v1749_v1 = vpop.f32.mrf.mxu0  ;;  %v1863_v2 = vpop.f32.mrf.mxu1 }
 0x11d   : > { %v2839_v3 = vpop.f32.mrf.mxu0  ;;  %v2841_v4 = vpop.f32.mrf.mxu1 }
 0x11e   : > { %3300 = vst [vmem:[#allocation15_spill] sm:$0xff] %v2841_v4 }
 0x11f   : > { %v1752_v6 = vpop.f32.mrf.mxu0  ;;  %v1866_v7 = vpop.f32.mrf.mxu1 }
 0x120   : > { %v1069_v7 = vmax.f32 %v1065_v61, %v2813_v39 }
 0x121   : > { %v2843_v8 = vpop.f32.mrf.mxu0  ;;  %v2845_v9 = vpop.f32.mrf.mxu1 }
 0x122   : > { %3301 = vst [vmem:[#allocation16_spill] sm:$0xff] %v2845_v9 }
 0x123   : > { %v1755_v10 = vpop.f32.mrf.mxu0  ;;  %v1869_v11 = vpop.f32.mrf.mxu1 }
 0x125   : > { %v2847_v12 = vpop.f32.mrf.mxu0  ;;  %v2849_v13 = vpop.f32.mrf.mxu1 }
 0x126   : > { %3302 = vst [vmem:[#allocation17_spill] sm:$0xff] %v2849_v13 }
 0x127   : > { %v1758_v14 = vpop.f32.mrf.mxu0  ;;  %v1872_v15 = vpop.f32.mrf.mxu1 }
 0x129   : > { %v2851_v16 = vpop.f32.mrf.mxu0  ;;  %v2853_v17 = vpop.f32.mrf.mxu1 }
 0x12a   : > { %3303 = vst [vmem:[#allocation18_spill] sm:$0xff] %v2853_v17 }
 0x12b   : > { %v1761_v18 = vpop.f32.mrf.mxu0  ;;  %v1875_v19 = vpop.f32.mrf.mxu1 }
 0x12c   : > { %v1058_v18 = vmax.f32 %v2817_v43, %v1069_v7 }
 0x12d   : > { %v2855_v20 = vpop.f32.mrf.mxu0  ;;  %v2857_v21 = vpop.f32.mrf.mxu1 }
 0x12e   : > { %3304 = vst [vmem:[#allocation19_spill] sm:$0xff] %v2857_v21 }
 0x12f   : > { %v1764_v22 = vpop.f32.mrf.mxu0  ;;  %v1878_v25 = vpop.f32.mrf.mxu1 }
 0x130   : > { %v1062_v25 = vmax.f32 %v1058_v18, %v2821_v47 }
 0x131   : > { %v2859_v26 = vpop.f32.mrf.mxu0  ;;  %v2861_v29 = vpop.f32.mrf.mxu1 }
 0x132   : > { %3305 = vst [vmem:[#allocation20_spill] sm:$0xff] %v2861_v29 }
 0x133   : > { %v1767_v30 = vpop.f32.mrf.mxu0  ;;  %v1881_v32 = vpop.f32.mrf.mxu1 }
 0x135   : > { %v2863_v33 = vpop.f32.mrf.mxu0  ;;  %v2865_v36 = vpop.f32.mrf.mxu1 }
 0x136   : > { %3306 = vst [vmem:[#allocation21_spill] sm:$0xff] %v2865_v36 }
 0x137   : > { %v1770_v37 = vpop.f32.mrf.mxu0  ;;  %v1884_v40 = vpop.f32.mrf.mxu1 }
 0x138   : > { %v1066_v37 = vmax.f32 %v1062_v25, %v2825_v51 }
 0x139   : > { %v2869_v44 = vpop.f32.mrf.mxu0  ;;  %v2871_v45 = vpop.f32.mrf.mxu1 }
 0x13a   : > { %3307 = vst [vmem:[#allocation22_spill] sm:$0xff] %v2871_v45 }
 0x13b   : > { %v1773_v48 = vpop.f32.mrf.mxu0  ;;  %v1887_v49 = vpop.f32.mrf.mxu1 }
 0x13c   : > { %v1070_v48 = vmax.f32 %v1066_v37, %v2829_v56 }
 0x13d   : > { %v2874_v53 = vpop.f32.mrf.mxu0  ;;  %v2876_v54 = vpop.f32.mrf.mxu1 }
 0x13e   : > { %3308 = vst [vmem:[#allocation23_spill] sm:$0xff] %v2876_v54 }
 0x13f   : > { %v1776_v57 = vpop.f32.mrf.mxu0  ;;  %v1890_v58 = vpop.f32.mrf.mxu1 }
 0x140   : > { %v1073_v57 = vmax.f32 %v2833_v60, %v1070_v48 }
 0x141   : > { %v2879_v62 = vpop.f32.mrf.mxu0  ;;  %v2881_v1 = vpop.f32.mrf.mxu1 }
 0x142   : > { %3309 = vst [vmem:[#allocation24_spill] sm:$0xff] %v2881_v1 }
 0x143   : > { %v1779_v2 = vpop.f32.mrf.mxu0  ;;  %v1893_v6 = vpop.f32.mrf.mxu1 }
 0x144   : > { %v1077_v2 = vmax.f32 %v1073_v57, %v2837_v0  ;;  %v1024_v0 = vmax.f32 %v2799_v27, %v2815_v42 }
 0x145   : > { %v2884_v10 = vpop.f32.mrf.mxu0  ;;  %v2886_v11 = vpop.f32.mrf.mxu1 }
 0x146   : > { %3310 = vst [vmem:[#allocation25_spill] sm:$0xff] %v2886_v11 }
 0x147   : > { %v1782_v14 = vpop.f32.mrf.mxu0  ;;  %v1896_v15 = vpop.f32.mrf.mxu1 }
 0x148   : > { %v1081_v14 = vmax.f32 %v1077_v2, %v2841_v4 }
 0x149   : > { %v2889_v19 = vpop.f32.mrf.mxu0  ;;  %v2891_v22 = vpop.f32.mrf.mxu1 }
 0x14a   : > { %3311 = vst [vmem:[#allocation26_spill] sm:$0xff] %v2891_v22  ;;  %v1085_v25 = vmax.f32 %v1081_v14, %v2845_v9 }
 0x14b   : > { %v1785_v30 = vpop.f32.mrf.mxu0  ;;  %v1899_v32 = vpop.f32.mrf.mxu1 }
 0x14c   : > { %v1089_v37 = vmax.f32 %v1085_v25, %v2849_v13 }
 0x14d   : > { %v2895_v40 = vpop.f32.mrf.mxu0  ;;  %v2897_v41 = vpop.f32.mrf.mxu1 }
 0x14e   : > { %3312 = vst [vmem:[#allocation27_spill] sm:$0xff] %v2897_v41 }
 0x14f   : > { %v1788_v49 = vpop.f32.mrf.mxu0  ;;  %v1902_v52 = vpop.f32.mrf.mxu1 }
 0x150   : > { %v1059_v52 = vmax.f32 %v2853_v17, %v1089_v37 }
 0x151   : > { %v2901_v58 = vpop.f32.mrf.mxu0  ;;  %v2903_v61 = vpop.f32.mrf.mxu1 }
 0x152   : > { %3313 = vst [vmem:[#allocation28_spill] sm:$0xff] %v2903_v61  ;;  %v1063_v2 = vmax.f32 %v1059_v52, %v2857_v21 }
 0x153   : > { %v1791_v6 = vpop.f32.mrf.mxu0  ;;  %v1905_v7 = vpop.f32.mrf.mxu1 }
 0x154   : > { %v1067_v14 = vmax.f32 %v1063_v2, %v2861_v29 }
 0x155   : > { %v2907_v15 = vpop.f32.mrf.mxu0  ;;  %v2909_v18 = vpop.f32.mrf.mxu1 }
 0x156   : > { %3314 = vst [vmem:[#allocation29_spill] sm:$0xff] %v2909_v18  ;;  %v1071_v25 = vmax.f32 %v1067_v14, %v2865_v36 }
 0x157   : > { %v1794_v30 = vpop.f32.mrf.mxu0  ;;  %v1908_v32 = vpop.f32.mrf.mxu1 }
 0x158   : > { %v1074_v37 = vmax.f32 %v2871_v45, %v1071_v25 }
 0x159   : > { %v2913_v48 = vpop.f32.mrf.mxu0  ;;  %v2915_v49 = vpop.f32.mrf.mxu1 }
 0x15a   : > { %3315 = vst [vmem:[#allocation30_spill] sm:$0xff] %v2915_v49  ;;  %v1078_v52 = vmax.f32 %v1074_v37, %v2876_v54  ;;  %v1025_v37 = vmax.f32 %v2803_v31, %v2819_v46 }
 0x15b   : > { %v1797_v57 = vpop.f32.mrf.mxu0  ;;  %v1911_v6 = vpop.f32.mrf.mxu1 }
 0x15c   : > { %v1082_v2 = vmax.f32 %v1078_v52, %v2881_v1 }
 0x15d   : > { %v2919_v7 = vpop.f32.mrf.mxu0  ;;  %v2921_v4 = vpop.f32.mrf.mxu1 }
 0x15e   : > { %3316 = vst [vmem:[#allocation31_spill] sm:$0xff] %v2921_v4  ;;  %v1086_v14 = vmax.f32 %v1082_v2, %v2886_v11 }
 0x15f   : > { %v1800_v30 = vpop.f32.mrf.mxu0  ;;  %v1914_v32 = vpop.f32.mrf.mxu1 }
 0x160   : > { %v1090_v25 = vmax.f32 %v1086_v14, %v2891_v22  ;;  %v1026_v14 = vmax.f32 %v2807_v34, %v2823_v50 }
 0x161   : > { %v2925_v13 = vpop.f32.mrf.mxu0  ;;  %v2927_v9 = vpop.f32.mrf.mxu1 }
 0x162   : > { %3317 = vst [vmem:[#allocation32_spill] sm:$0xff] %v2927_v9  ;;  %v1060_v54 = vmax.f32 %v2897_v41, %v1090_v25  ;;  %v1023_v41 = vmax.f32 %v2795_v23, %v2811_v38 }
 0x163   : > { %v1803_v57 = vpop.f32.mrf.mxu0  ;;  %v1917_v6 = vpop.f32.mrf.mxu1 }
 0x164   : > { %v1064_v2 = vmax.f32 %v1060_v54, %v2903_v61  ;;  %v1027_v1 = vmax.f32 %v1023_v41, %v2827_v55 }
 0x165   : > { %v2931_v21 = vpop.f32.mrf.mxu0  ;;  %v2933_v17 = vpop.f32.mrf.mxu1 }
 0x166   : > { %3318 = vst [vmem:[#allocation33_spill] sm:$0xff] %v2933_v17 }
 0x167   : > { %v1806_v30 = vpop.f32.mrf.mxu0  ;;  %v1920_v32 = vpop.f32.mrf.mxu1 }
 0x168   : > { %v1029_v30 = vmax.f32 %v1025_v37, %v2835_v63  ;;  %v1030_v37 = vmax.f32 %v1026_v14, %v2839_v3 }
 0x169   : > { %v2937_v36 = vpop.f32.mrf.mxu0  ;;  %v2939_v29 = vpop.f32.mrf.mxu1 }
 0x16a   : > { %3319 = vst [vmem:[#allocation34_spill] sm:$0xff] %v2939_v29 }
 0x16b   : > { %v1809_v57 = vpop.f32.mrf.mxu0  ;;  %v1923_v6 = vpop.f32.mrf.mxu1 }
 0x16c   : > { %v1033_v57 = vmax.f32 %v1029_v30, %v2851_v16  ;;  %v1068_v6 = vmax.f32 %v1064_v2, %v2909_v18  ;;  %v1034_v30 = vmax.f32 %v1030_v37, %v2855_v20  ;;  %v1028_v37 = vmax.f32 %v1024_v0, %v2831_v59 }
 0x16d   : > { %v2945_v45 = vpop.f32.mrf.mxu0  ;;  %v2947_v52 = vpop.f32.mrf.mxu1 }
 0x16e   : > { %3320 = vst [vmem:[#allocation35_spill] sm:$0xff] %v2947_v52  ;;  %v1037_v54 = vmax.f32 %v1033_v57, %v2869_v44  ;;  %v1031_v57 = vmax.f32 %v1027_v1, %v2843_v8  ;;  %v1032_v1 = vmax.f32 %v1028_v37, %v2847_v12 }
 0x16f   : > { %v1812_v32 = vpop.f32.mrf.mxu0  ;;  %v1926_v11 = vpop.f32.mrf.mxu1 }
 0x170   : > { %v1072_v11 = vmax.f32 %v1068_v6, %v2915_v49  ;;  %v1041_v2 = vmax.f32 %v1037_v54, %v2889_v19  ;;  %v1038_v6 = vmax.f32 %v1034_v30, %v2874_v53 }
 0x171   : > { %v2955_v22 = vpop.f32.mrf.mxu0  ;;  %v2957_v25 = vpop.f32.mrf.mxu1 }
 0x172   : > { %v1075_v18 = vmax.f32 %v2921_v4, %v1072_v11  ;;  %v1035_v11 = vmax.f32 %v1031_v57, %v2859_v26  ;;  %v1042_v4 = vmax.f32 %v1038_v6, %v2895_v40 }
 0x173   : > { %v1815_v32 = vpop.f32.mrf.mxu0  ;;  %v1929_v61 = vpop.f32.mrf.mxu1 }
 0x174   : > { %v1045_v61 = vmax.f32 %v1041_v2, %v2913_v48  ;;  %v1079_v41 = vmax.f32 %v1075_v18, %v2927_v9  ;;  %v1039_v18 = vmax.f32 %v1035_v11, %v2879_v62  ;;  %v1046_v0 = vmax.f32 %v1042_v4, %v2919_v7 }
 0x175   : > { %v2970_v60 = vpop.f32.mrf.mxu0  ;;  %v2972_v14 = vpop.f32.mrf.mxu1 }
 0x176   : > { %v1049_v49 = vmax.f32 %v1045_v61, %v2937_v36  ;;  %v1083_v56 = vmax.f32 %v1079_v41, %v2933_v17  ;;  %v1036_v61 = vmax.f32 %v1032_v1, %v2863_v33  ;;  %v1043_v41 = vmax.f32 %v1039_v18, %v2901_v58 }
 0x177   : > { %v1818_v54 = vpop.f32.mrf.mxu0  ;;  %v1932_v32 = vpop.f32.mrf.mxu1  ;;  %v1050_v37 = vmax.f32 %v1046_v0, %v2945_v45 }
 0x178   : > { %v1087_v2 = vmax.f32 %v1083_v56, %v2939_v29  ;;  %v1040_v11 = vmax.f32 %v1036_v61, %v2884_v10  ;;  %v1047_v4 = vmax.f32 %v1043_v41, %v2925_v13 }
 0x179   : > { %v2984_v51 = vpop.f32.mrf.mxu0  ;;  %v2986_v30 = vpop.f32.mrf.mxu1 }
 0x17a   : > { %v1053_v57 = vmax.f32 %v1049_v49, %v2984_v51  ;;  %v1044_v1 = vmax.f32 %v1040_v11, %v2907_v15  ;;  %v1051_v18 = vmax.f32 %v1047_v4, %v2955_v22 }
 0x17b   : > { %v1821_v54 = vpop.f32.mrf.mxu0  ;;  %v1935_v6 = vpop.f32.mrf.mxu1 }
 0x17c   : > { %v1091_v32 = vmax.f32 %v1087_v2, %v1053_v57  ;;  %v1048_v29 = vmax.f32 %v1044_v1, %v2931_v21 }
 0x17d   : > { %v2995_v17 = vpop.f32.mrf.mxu0  ;;  %v2997_v9 = vpop.f32.mrf.mxu1 }
 0x17e   : > { %v1076_v56 = vmax.f32 %v2947_v52, %v1091_v32  ;;  %v1054_v49 = vmax.f32 %v1050_v37, %v2995_v17  ;;  %v1052_v37 = vmax.f32 %v1048_v29, %v2970_v60 }
 0x17f   : > { %v1824_v54 = vpop.f32.mrf.mxu0  ;;  %v1938_v6 = vpop.f32.mrf.mxu1 }
 0x180   : > { %v1080_v0 = vmax.f32 %v1076_v56, %v1054_v49 }
 0x181   : > { %v3005_v2 = vpop.f32.mrf.mxu0  ;;  %v3007_v57 = vpop.f32.mrf.mxu1 }
 0x182   : > { %v1084_v61 = vmax.f32 %v1080_v0, %v2957_v25  ;;  %v1055_v41 = vmax.f32 %v1051_v18, %v3005_v2 }
 0x183   : > { %v1827_v32 = vpop.f32.mrf.mxu0  ;;  %v1941_v52 = vpop.f32.mrf.mxu1 }
 0x184   : > { %v1088_v54 = vmax.f32 %v1084_v61, %v1055_v41  ;;  %v1109_v61 = vlaneseq  ;;  %v3020_v41 = vld [vmem:[#allocation2] sm:$0x1] }
 0x185   : > { %v3013_v6 = vpop.f32.mrf.mxu0 }
 0x186   : > { %v1092_v11 = vmax.f32 %v1088_v54, %v2972_v14  ;;  %v1056_v4 = vmax.f32 %v1052_v37, %v3013_v6  ;;  %v1110_v37 = vshrl.u32 %v1109_v61, 7 }
 0x187   : > { %v1830_v56 = vpop.f32.mrf.mxu0 }
 0x188   : > { %v1094_v49 = vmax.f32 %v1056_v4, %v1092_v11 }
 0x18a   : > { %v1093_v47 = vmax.f32 %v2986_v30, %v1094_v49 }
 0x18c   : > { %v1095_v1 = vmax.f32 %v1093_v47, %v2997_v9  ;;  %v1111_v47 = vsub.s32 0, %v1110_v37 }
 0x18e   : > { %v1096_v0 = vmax.f32 %v3007_v57, %v1095_v1 }
 0x190   : > { %v1097_v18 = vrot.slane %v1096_v0, 4 }
 0x192   : > { %v1098_v32 = vmax.f32 %v1096_v0, %v1097_v18 }
 0x194   : > { %v1099_v52 = vrot.slane %v1098_v32, 2 }
 0x196   : > { %v1100_v43 = vmax.f32 %v1098_v32, %v1099_v52 }
 0x198   : > { %v1101_v29 = vrot.slane %v1100_v43, 1 }
 0x19a   : > { %v1102_v39 = vmax.f32 %v1100_v43, %v1101_v29 }
 0x19c   : > { %v3023_v54 = vmax.f32 %v3020_v41, %v1102_v39 }
 0x19e   : > { %1423 = vst [vmem:[#allocation2] sm:$0x1] %v3023_v54  ;;  %v3029_v4 = vrot.slane %v3023_v54, %v1111_v47 }
 0x1a0   : > { %v1147_v56 = vsub.f32 %v2970_v60, %v3029_v4  ;;  %v1148_v49 = vsub.f32 %v2984_v51, %v3029_v4  ;;  %v1149_v39 = vsub.f32 %v2995_v17, %v3029_v4  ;;  %v1150_v43 = vsub.f32 %v3005_v2, %v3029_v4 }
 0x1a1   : > { %v1151_v1 = vsub.f32 %v3013_v6, %v3029_v4  ;;  %v1114_v29 = vsub.f32 %v2795_v23, %v3029_v4  ;;  %v1115_v37 = vsub.f32 %v2799_v27, %v3029_v4  ;;  %v1116_v11 = vsub.f32 %v2803_v31, %v3029_v4 }
 0x1a2   : > { %v1117_v32 = vsub.f32 %v2807_v34, %v3029_v4  ;;  %v1118_v52 = vsub.f32 %v2811_v38, %v3029_v4  ;;  %v1119_v61 = vsub.f32 %v2815_v42, %v3029_v4  ;;  %v1120_v27 = vsub.f32 %v2819_v46, %v3029_v4 }
 0x1a3   : > { %v1189_v47 = vmul.f32 1.442695, %v1114_v29  ;;  %v1191_v18 = vmul.f32 1.442695, %v1115_v37  ;;  %v1193_v23 = vmul.f32 1.442695, %v1116_v11  ;;  %v1121_v31 = vsub.f32 %v2823_v50, %v3029_v4 }
 0x1a4   : > { %v1195_v0 = vmul.f32 1.442695, %v1117_v32  ;;  %v1197_v29 = vmul.f32 1.442695, %v1118_v52  ;;  %v1199_v34 = vmul.f32 1.442695, %v1119_v61  ;;  %v1122_v37 = vsub.f32 %v2827_v55, %v3029_v4 }
 0x1a5   : > { %2012 = vpow2.f32 %v1189_v47  ;;  %v1201_v38 = vmul.f32 1.442695, %v1120_v27  ;;  %v1123_v11 = vsub.f32 %v2831_v59, %v3029_v4  ;;  %v1203_v42 = vmul.f32 1.442695, %v1121_v31 }
 0x1a6   : > { %2014 = vpow2.f32 %v1191_v18  ;;  %v1124_v46 = vsub.f32 %v2835_v63, %v3029_v4  ;;  %v1205_v32 = vmul.f32 1.442695, %v1122_v37  ;;  %v1125_v50 = vsub.f32 %v2839_v3, %v3029_v4 }
 0x1a7   : > { %2016 = vpow2.f32 %v1193_v23  ;;  %v1126_v55 = vsub.f32 %v2843_v8, %v3029_v4  ;;  %v1127_v23 = vsub.f32 %v2847_v12, %v3029_v4  ;;  %v1128_v31 = vsub.f32 %v2851_v16, %v3029_v4 }
 0x1a8   : > { %2018 = vpow2.f32 %v1195_v0  ;;  %v1207_v0 = vmul.f32 1.442695, %v1123_v11  ;;  %v1209_v61 = vmul.f32 1.442695, %v1124_v46  ;;  %v1211_v63 = vmul.f32 1.442695, %v1125_v50 }
 0x1a9   : > { %2020 = vpow2.f32 %v1197_v29  ;;  %v1213_v3 = vmul.f32 1.442695, %v1126_v55  ;;  %v1129_v8 = vsub.f32 %v2855_v20, %v3029_v4  ;;  %v1130_v12 = vsub.f32 %v2859_v26, %v3029_v4 }
 0x1aa   : > { %2022 = vpow2.f32 %v1199_v34  ;;  %v1131_v16 = vsub.f32 %v2863_v33, %v3029_v4  ;;  %v1132_v20 = vsub.f32 %v2869_v44, %v3029_v4  ;;  %v1133_v26 = vsub.f32 %v2874_v53, %v3029_v4 }
 0x1ab   : > { %2024 = vpow2.f32 %v1201_v38  ;;  %v1215_v38 = vmul.f32 1.442695, %v1127_v23  ;;  %v1221_v55 = vmul.f32 1.442695, %v1130_v12  ;;  %v1134_v33 = vsub.f32 %v2879_v62, %v3029_v4 }
 0x1ac   : > { %2026 = vpow2.f32 %v1203_v42  ;;  %v1135_v44 = vsub.f32 %v2884_v10, %v3029_v4  ;;  %v1136_v53 = vsub.f32 %v2889_v19, %v3029_v4  ;;  %v1137_v62 = vsub.f32 %v2895_v40, %v3029_v4 }
 0x1ad   : > { %2028 = vpow2.f32 %v1205_v32  ;;  %v1138_v10 = vsub.f32 %v2901_v58, %v3029_v4  ;;  %v1139_v19 = vsub.f32 %v2907_v15, %v3029_v4  ;;  %v1140_v40 = vsub.f32 %v2913_v48, %v3029_v4 }
 0x1ae   : > { %2030 = vpow2.f32 %v1207_v0  ;;  %v1141_v58 = vsub.f32 %v2919_v7, %v3029_v4  ;;  %v1142_v15 = vsub.f32 %v2925_v13, %v3029_v4  ;;  %v1143_v48 = vsub.f32 %v2931_v21, %v3029_v4 }
 0x1af   : > { %2032 = vpow2.f32 %v1209_v61  ;;  %v1144_v7 = vsub.f32 %v2937_v36, %v3029_v4  ;;  %v1145_v13 = vsub.f32 %v2945_v45, %v3029_v4  ;;  %v1146_v21 = vsub.f32 %v2955_v22, %v3029_v4 }
 0x1b0   : > { %2034 = vpow2.f32 %v1211_v63  ;;  %v1255_v45 = vmul.f32 1.442695, %v1147_v56  ;;  %v1257_v22 = vmul.f32 1.442695, %v1148_v49  ;;  %v1152_v60 = vsub.f32 %v2797_v24, %v3029_v4 }
 0x1b1   : > { %2036 = vpow2.f32 %v1213_v3  ;;  %v1227_v3 = vmul.f32 1.442695, %v1133_v26  ;;  %v1251_v36 = vmul.f32 1.442695, %v1145_v13  ;;  %v1261_v56 = vmul.f32 1.442695, %v1150_v43 }
 0x1b2   : > { %v2013_v18 = vpop.eup %2012  ;;  %2038 = vpow2.f32 %v1215_v38  ;;  %v1153_v49 = vsub.f32 %v2801_v28, %v3029_v4  ;;  %v1263_v17 = vmul.f32 1.442695, %v1151_v1  ;;  %v1154_v24 = vsub.f32 %v2805_v5, %v3029_v4  ;;  %v3322_v5 = vld [vmem:[#allocation9_spill] sm:$0xff] }
 0x1b3   : > { %v2015_v52 = vpop.eup %2014  ;;  %v1155_v43 = vsub.f32 %v2809_v35, %v3029_v4  ;;  %v3323_v35 = vld [vmem:[#allocation10_spill] sm:$0xff] }
 0x1b4   : > { %v1341_v59 = vadd.f32 %v2015_v52, %v2013_v18  ;;  %v2017_v47 = vpop.eup %2016  ;;  %v1217_v18 = vmul.f32 1.442695, %v1128_v31  ;;  %v1219_v52 = vmul.f32 1.442695, %v1129_v8  ;;  %v1229_v8 = vmul.f32 1.442695, %v1134_v33 }
 0x1b5   : > { %v2019_v29 = vpop.eup %2018  ;;  %v1269_v1 = vmul.f32 1.442695, %v1154_v24 }
 0x1b6   : > { %v1342_v27 = vadd.f32 %v2017_v47, %v1341_v59  ;;  %v2021_v37 = vpop.eup %2020  ;;  %2040 = vpow2.f32 %v1217_v18  ;;  %v1223_v47 = vmul.f32 1.442695, %v1131_v16 }
 0x1b7   : > { %v2023_v42 = vpop.eup %2022  ;;  %2042 = vpow2.f32 %v1219_v52  ;;  %v1235_v52 = vmul.f32 1.442695, %v1137_v62 }
 0x1b8   : > { %v1343_v34 = vadd.f32 %v2019_v29, %v1342_v27  ;;  %v2025_v32 = vpop.eup %2024  ;;  %2044 = vpow2.f32 %v1221_v55  ;;  %v1225_v27 = vmul.f32 1.442695, %v1132_v20  ;;  %v1237_v20 = vmul.f32 1.442695, %v1138_v10 }
 0x1b9   : > { %v2027_v0 = vpop.eup %2026  ;;  %2046 = vpow2.f32 %v1223_v47 }
 0x1ba   : > { %v1344_v11 = vadd.f32 %v2021_v37, %v1343_v34  ;;  %v2029_v59 = vpop.eup %2028  ;;  %2048 = vpow2.f32 %v1225_v27  ;;  %v1243_v27 = vmul.f32 1.442695, %v1141_v58 }
 0x1bb   : > { %v2031_v63 = vpop.eup %2030  ;;  %2050 = vpow2.f32 %v1227_v3 }
 0x1bc   : > { %v1345_v46 = vadd.f32 %v2023_v42, %v1344_v11  ;;  %v2033_v31 = vpop.eup %2032  ;;  %v1231_v42 = vmul.f32 1.442695, %v1135_v44  ;;  %2052 = vpow2.f32 %v1229_v8  ;;  %v1245_v44 = vmul.f32 1.442695, %v1142_v15 }
 0x1bd   : > { %v2035_v37 = vpop.eup %2034 }
 0x1be   : > { %v1346_v50 = vadd.f32 %v2025_v32, %v1345_v46  ;;  %v2037_v11 = vpop.eup %2036  ;;  %v1233_v46 = vmul.f32 1.442695, %v1136_v53  ;;  %2054 = vpow2.f32 %v1231_v42 }
 0x1bf   : > { %v2039_v18 = vpop.eup %2038 }
 0x1c0   : > { %v1347_v61 = vadd.f32 %v2027_v0, %v1346_v50  ;;  %2056 = vpow2.f32 %v1233_v46 }
 0x1c1   : > { %2058 = vpow2.f32 %v1235_v52 }
 0x1c2   : > { %v1348_v23 = vadd.f32 %v2029_v59, %v1347_v61  ;;  %v1239_v59 = vmul.f32 1.442695, %v1139_v19  ;;  %2060 = vpow2.f32 %v1237_v20 }
 0x1c3   : > { %v2041_v16 = vpop.eup %2040 }
 0x1c4   : > { %v1349_v29 = vadd.f32 %v2031_v63, %v1348_v23  ;;  %v2043_v0 = vpop.eup %2042  ;;  %v1241_v23 = vmul.f32 1.442695, %v1140_v40  ;;  %2062 = vpow2.f32 %v1239_v59  ;;  %v1267_v59 = vmul.f32 1.442695, %v1153_v49 }
 0x1c5   : > { %v2045_v61 = vpop.eup %2044 }
 0x1c6   : > { %v1350_v34 = vadd.f32 %v2033_v31, %v1349_v29  ;;  %v2047_v47 = vpop.eup %2046  ;;  %2064 = vpow2.f32 %v1241_v23 }
 0x1c7   : > { %v2049_v33 = vpop.eup %2048  ;;  %2066 = vpow2.f32 %v1243_v27 }
 0x1c8   : > { %v1351_v38 = vadd.f32 %v2035_v37, %v1350_v34  ;;  %v2051_v31 = vpop.eup %2050  ;;  %v1247_v37 = vmul.f32 1.442695, %v1143_v48  ;;  %2068 = vpow2.f32 %v1245_v44 }
 0x1c9   : > { %v2053_v34 = vpop.eup %2052 }
 0x1ca   : > { %v1352_v12 = vadd.f32 %v2037_v11, %v1351_v38  ;;  %v1249_v38 = vmul.f32 1.442695, %v1144_v7  ;;  %2070 = vpow2.f32 %v1247_v37 }
 0x1cb   : > { %v2055_v8 = vpop.eup %2054 }
 0x1cc   : > { %v1353_v32 = vadd.f32 %v2039_v18, %v1352_v12  ;;  %2072 = vpow2.f32 %v1249_v38  ;;  %v1253_v18 = vmul.f32 1.442695, %v1146_v21 }
 0x1cd   : > { %v2057_v62 = vpop.eup %2056  ;;  %2074 = vpow2.f32 %v1251_v36  ;;  %v3326_v36 = vld [vmem:[#allocation13_spill] sm:$0xff] }
 0x1ce   : > { %v1354_v50 = vadd.f32 %v2041_v16, %v1353_v32  ;;  %v2059_v12 = vpop.eup %2058  ;;  %2076 = vpow2.f32 %v1253_v18 }
 0x1cf   : > { %v2061_v46 = vpop.eup %2060  ;;  %2078 = vpow2.f32 %v1255_v45 }
 0x1d0   : > { %v1355_v55 = vadd.f32 %v2043_v0, %v1354_v50  ;;  %v1259_v50 = vmul.f32 1.442695, %v1149_v39  ;;  %2080 = vpow2.f32 %v1257_v22 }
 0x1d1   : > { %v2063_v16 = vpop.eup %2062 }
 0x1d2   : > { %v1356_v26 = vadd.f32 %v2045_v61, %v1355_v55  ;;  %2082 = vpow2.f32 %v1259_v50  ;;  %v1265_v61 = vmul.f32 1.442695, %v1152_v60  ;;  %v3329_v60 = vld [vmem:[#allocation16_spill] sm:$0xff] }
 0x1d3   : > { %v2065_v52 = vpop.eup %2064  ;;  %2084 = vpow2.f32 %v1261_v56  ;;  %v1164_v56 = vsub.f32 %v3329_v60, %v3029_v4 }
 0x1d4   : > { %v1357_v63 = vadd.f32 %v2047_v47, %v1356_v26  ;;  %v2067_v40 = vpop.eup %2066  ;;  %2086 = vpow2.f32 %v1263_v17  ;;  %v3321_v47 = vld [vmem:[#allocation8_spill] sm:$0xff]  ;;  %v3330_v17 = vld [vmem:[#allocation17_spill] sm:$0xff] }
 0x1d5   : > { %v2069_v51 = vpop.eup %2068  ;;  %v1156_v6 = vsub.f32 %v3321_v47, %v3029_v4  ;;  %2088 = vpow2.f32 %v1265_v61 }
 0x1d6   : > { %v1358_v29 = vadd.f32 %v2049_v33, %v1357_v63  ;;  %v1157_v63 = vsub.f32 %v3322_v5, %v3029_v4  ;;  %2090 = vpow2.f32 %v1267_v59  ;;  %v1271_v33 = vmul.f32 1.442695, %v1155_v43 }
 0x1d7   : > { %v2071_v55 = vpop.eup %2070  ;;  %2092 = vpow2.f32 %v1269_v1  ;;  %v1289_v43 = vmul.f32 1.442695, %v1164_v56 }
 0x1d8   : > { %v1359_v3 = vadd.f32 %v2051_v31, %v1358_v29  ;;  %v1158_v29 = vsub.f32 %v3323_v35, %v3029_v4  ;;  %v1273_v31 = vmul.f32 1.442695, %v1156_v6  ;;  %2094 = vpow2.f32 %v1271_v33 }
 0x1d9   : > { %v2073_v2 = vpop.eup %2072  ;;  %v1275_v13 = vmul.f32 1.442695, %v1157_v63 }
 0x1da   : > { %v1360_v53 = vadd.f32 %v2053_v34, %v1359_v3  ;;  %v2075_v26 = vpop.eup %2074  ;;  %v3324_v3 = vld [vmem:[#allocation11_spill] sm:$0xff]  ;;  %2096 = vpow2.f32 %v1273_v31  ;;  %v1277_v38 = vmul.f32 1.442695, %v1158_v29 }
 0x1db   : > { %v2077_v23 = vpop.eup %2076  ;;  %v1159_v34 = vsub.f32 %v3324_v3, %v3029_v4  ;;  %2098 = vpow2.f32 %v1275_v13 }
 0x1dc   : > { %v1361_v11 = vadd.f32 %v2055_v8, %v1360_v53  ;;  %v2079_v27 = vpop.eup %2078  ;;  %v3325_v8 = vld [vmem:[#allocation12_spill] sm:$0xff]  ;;  %2100 = vpow2.f32 %v1277_v38 }
 0x1dd   : > { %v2081_v44 = vpop.eup %2080  ;;  %v1160_v21 = vsub.f32 %v3325_v8, %v3029_v4 }
 0x1de   : > { %v1362_v42 = vadd.f32 %v2057_v62, %v1361_v11 }
 0x1df   : > { %v2083_v53 = vpop.eup %2082 }
 0x1e0   : > { %v1363_v10 = vadd.f32 %v2059_v12, %v1362_v42  ;;  %v2085_v62 = vpop.eup %2084  ;;  %v1161_v42 = vsub.f32 %v3326_v36, %v3029_v4  ;;  %v1279_v12 = vmul.f32 1.442695, %v1159_v34 }
 0x1e2   : > { %v1364_v32 = vadd.f32 %v2061_v46, %v1363_v10  ;;  %v2087_v10 = vpop.eup %2086  ;;  %v3327_v46 = vld [vmem:[#allocation14_spill] sm:$0xff]  ;;  %2102 = vpow2.f32 %v1279_v12  ;;  %v1283_v50 = vmul.f32 1.442695, %v1161_v42 }
 0x1e3   : > { %v1162_v45 = vsub.f32 %v3327_v46, %v3029_v4  ;;  %v2089_v22 = vpop.eup %2088 }
 0x1e4   : > { %v1365_v19 = vadd.f32 %v2063_v16, %v1364_v32  ;;  %v1281_v32 = vmul.f32 1.442695, %v1160_v21 }
 0x1e6   : > { %v1366_v0 = vadd.f32 %v2065_v52, %v1365_v19  ;;  %v3328_v19 = vld [vmem:[#allocation15_spill] sm:$0xff]  ;;  %2104 = vpow2.f32 %v1281_v32 }
 0x1e7   : > { %v1163_v52 = vsub.f32 %v3328_v19, %v3029_v4  ;;  %2106 = vpow2.f32 %v1283_v50 }
 0x1e8   : > { %v1367_v20 = vadd.f32 %v2067_v40, %v1366_v0  ;;  %v2091_v40 = vpop.eup %2090 }
 0x1e9   : > { %v2093_v49 = vpop.eup %2092 }
 0x1ea   : > { %v1368_v39 = vadd.f32 %v2069_v51, %v1367_v20  ;;  %v1285_v20 = vmul.f32 1.442695, %v1162_v45  ;;  %v2095_v61 = vpop.eup %2094 }
 0x1ec   : > { %v1369_v58 = vadd.f32 %v2071_v55, %v1368_v39  ;;  %v1165_v39 = vsub.f32 %v3330_v17, %v3029_v4  ;;  %v1287_v55 = vmul.f32 1.442695, %v1163_v52  ;;  %2108 = vpow2.f32 %v1285_v20 }
 0x1ee   : > { %v1370_v28 = vadd.f32 %v2073_v2, %v1369_v58  ;;  %v3331_v58 = vld [vmem:[#allocation18_spill] sm:$0xff]  ;;  %2110 = vpow2.f32 %v1287_v55  ;;  %v1291_v6 = vmul.f32 1.442695, %v1165_v39 }
 0x1ef   : > { %v1166_v2 = vsub.f32 %v3331_v58, %v3029_v4  ;;  %2112 = vpow2.f32 %v1289_v43 }
 0x1f0   : > { %v1371_v15 = vadd.f32 %v2075_v26, %v1370_v28  ;;  %v2097_v28 = vpop.eup %2096  ;;  %v3332_v26 = vld [vmem:[#allocation19_spill] sm:$0xff]  ;;  %2114 = vpow2.f32 %v1291_v6 }
 0x1f1   : > { %v1167_v47 = vsub.f32 %v3332_v26, %v3029_v4  ;;  %v1293_v63 = vmul.f32 1.442695, %v1166_v2 }
 0x1f2   : > { %v1372_v48 = vadd.f32 %v2077_v23, %v1371_v15  ;;  %v2099_v15 = vpop.eup %2098  ;;  %v3333_v23 = vld [vmem:[#allocation20_spill] sm:$0xff] }
 0x1f3   : > { %v1168_v5 = vsub.f32 %v3333_v23, %v3029_v4  ;;  %v1295_v29 = vmul.f32 1.442695, %v1167_v47  ;;  %2116 = vpow2.f32 %v1293_v63 }
 0x1f4   : > { %v1373_v7 = vadd.f32 %v2079_v27, %v1372_v48  ;;  %v2101_v48 = vpop.eup %2100  ;;  %v3334_v27 = vld [vmem:[#allocation21_spill] sm:$0xff] }
 0x1f5   : > { %v1169_v35 = vsub.f32 %v3334_v27, %v3029_v4  ;;  %v1297_v34 = vmul.f32 1.442695, %v1168_v5  ;;  %2118 = vpow2.f32 %v1295_v29 }
 0x1f6   : > { %v1374_v37 = vadd.f32 %v2081_v44, %v1373_v7  ;;  %v2103_v7 = vpop.eup %2102  ;;  %v3335_v44 = vld [vmem:[#allocation22_spill] sm:$0xff] }
 0x1f7   : > { %v1170_v3 = vsub.f32 %v3335_v44, %v3029_v4  ;;  %v1299_v21 = vmul.f32 1.442695, %v1169_v35  ;;  %2120 = vpow2.f32 %v1297_v34 }
 0x1f8   : > { %v1375_v11 = vadd.f32 %v2083_v53, %v1374_v37  ;;  %v2105_v37 = vpop.eup %2104  ;;  %v3336_v53 = vld [vmem:[#allocation23_spill] sm:$0xff] }
 0x1f9   : > { %v1171_v8 = vsub.f32 %v3336_v53, %v3029_v4  ;;  %v1301_v42 = vmul.f32 1.442695, %v1170_v3  ;;  %2122 = vpow2.f32 %v1299_v21 }
 0x1fa   : > { %v1376_v18 = vadd.f32 %v2085_v62, %v1375_v11  ;;  %v2107_v11 = vpop.eup %2106  ;;  %v3337_v62 = vld [vmem:[#allocation24_spill] sm:$0xff] }
 0x1fb   : > { %v1172_v36 = vsub.f32 %v3337_v62, %v3029_v4  ;;  %v1303_v45 = vmul.f32 1.442695, %v1171_v8  ;;  %2124 = vpow2.f32 %v1301_v42 }
 0x1fc   : > { %v1377_v16 = vadd.f32 %v2087_v10, %v1376_v18  ;;  %v2109_v18 = vpop.eup %2108  ;;  %v3338_v10 = vld [vmem:[#allocation25_spill] sm:$0xff] }
 0x1fd   : > { %v1173_v46 = vsub.f32 %v3338_v10, %v3029_v4  ;;  %v1305_v52 = vmul.f32 1.442695, %v1172_v36  ;;  %2126 = vpow2.f32 %v1303_v45 }
 0x1fe   : > { %v1378_v0 = vadd.f32 %v2089_v22, %v1377_v16  ;;  %v2111_v16 = vpop.eup %2110  ;;  %v3339_v22 = vld [vmem:[#allocation26_spill] sm:$0xff] }
 0x1ff   : > { %v1174_v19 = vsub.f32 %v3339_v22, %v3029_v4  ;;  %v1307_v56 = vmul.f32 1.442695, %v1173_v46  ;;  %2128 = vpow2.f32 %v1305_v52  ;;  %v3349_v22 = vsub.f32 %v2957_v25, %v3029_v4 }
 0x200   : > { %v1379_v51 = vadd.f32 %v2091_v40, %v1378_v0  ;;  %v2113_v0 = vpop.eup %2112  ;;  %v3340_v40 = vld [vmem:[#allocation27_spill] sm:$0xff]  ;;  %v3352_v25 = vsub.f32 %v2997_v9, %v3029_v4 }
 0x201   : > { %v1175_v60 = vsub.f32 %v3340_v40, %v3029_v4  ;;  %v1309_v39 = vmul.f32 1.442695, %v1174_v19  ;;  %2130 = vpow2.f32 %v1307_v56  ;;  %v1329_v19 = vmul.f32 1.442695, %v3349_v22 }
 0x202   : > { %v1380_v24 = vadd.f32 %v2093_v49, %v1379_v51  ;;  %v2115_v51 = vpop.eup %2114  ;;  %v3341_v49 = vld [vmem:[#allocation28_spill] sm:$0xff] }
 0x203   : > { %v1176_v17 = vsub.f32 %v3341_v49, %v3029_v4  ;;  %v1311_v2 = vmul.f32 1.442695, %v1175_v60  ;;  %2132 = vpow2.f32 %v1309_v39  ;;  %v1335_v39 = vmul.f32 1.442695, %v3352_v25 }
 0x204   : > { %v1381_v59 = vadd.f32 %v2095_v61, %v1380_v24  ;;  %v2117_v24 = vpop.eup %2116  ;;  %v3342_v61 = vld [vmem:[#allocation29_spill] sm:$0xff] }
 0x205   : > { %v1177_v58 = vsub.f32 %v3342_v61, %v3029_v4  ;;  %v1313_v47 = vmul.f32 1.442695, %v1176_v17  ;;  %2134 = vpow2.f32 %v1311_v2 }
 0x206   : > { %v1382_v1 = vadd.f32 %v2097_v28, %v1381_v59  ;;  %v2119_v59 = vpop.eup %2118  ;;  %v3343_v28 = vld [vmem:[#allocation30_spill] sm:$0xff] }
 0x207   : > { %v1178_v26 = vsub.f32 %v3343_v28, %v3029_v4  ;;  %v1315_v5 = vmul.f32 1.442695, %v1177_v58  ;;  %2136 = vpow2.f32 %v1313_v47 }
 0x208   : > { %v1383_v33 = vadd.f32 %v2099_v15, %v1382_v1  ;;  %v2121_v1 = vpop.eup %2120  ;;  %v3344_v15 = vld [vmem:[#allocation31_spill] sm:$0xff] }
 0x209   : > { %v1179_v23 = vsub.f32 %v3344_v15, %v3029_v4  ;;  %v1317_v35 = vmul.f32 1.442695, %v1178_v26  ;;  %2138 = vpow2.f32 %v1315_v5 }
 0x20a   : > { %v1384_v31 = vadd.f32 %v2101_v48, %v1383_v33  ;;  %v2123_v33 = vpop.eup %2122  ;;  %v3345_v48 = vld [vmem:[#allocation32_spill] sm:$0xff] }
 0x20b   : > { %v1180_v27 = vsub.f32 %v3345_v48, %v3029_v4  ;;  %v1319_v3 = vmul.f32 1.442695, %v1179_v23  ;;  %2140 = vpow2.f32 %v1317_v35 }
 0x20c   : > { %v1385_v13 = vadd.f32 %v2103_v7, %v1384_v31  ;;  %v2125_v31 = vpop.eup %2124  ;;  %v3346_v7 = vld [vmem:[#allocation33_spill] sm:$0xff] }
 0x20d   : > { %v1181_v44 = vsub.f32 %v3346_v7, %v3029_v4  ;;  %v1321_v8 = vmul.f32 1.442695, %v1180_v27  ;;  %2142 = vpow2.f32 %v1319_v3 }
 0x20e   : > { %v1386_v38 = vadd.f32 %v2105_v37, %v1385_v13  ;;  %v2127_v13 = vpop.eup %2126  ;;  %v3347_v37 = vld [vmem:[#allocation34_spill] sm:$0xff] }
 0x20f   : > { %v1182_v53 = vsub.f32 %v3347_v37, %v3029_v4  ;;  %v1323_v36 = vmul.f32 1.442695, %v1181_v44  ;;  %2144 = vpow2.f32 %v1321_v8 }
 0x210   : > { %v1387_v12 = vadd.f32 %v2107_v11, %v1386_v38  ;;  %v2129_v38 = vpop.eup %2128  ;;  %v3348_v11 = vld [vmem:[#allocation35_spill] sm:$0xff] }
 0x211   : > { %v1183_v62 = vsub.f32 %v3348_v11, %v3029_v4  ;;  %2146 = vpow2.f32 %v1323_v36  ;;  %v1432_v11 = vld [vmem:[%s260_s28] sm:$0x1] }
 0x212   : > { %v1388_v32 = vadd.f32 %v2109_v18, %v1387_v12  ;;  %v2131_v12 = vpop.eup %2130  ;;  %v1325_v18 = vmul.f32 1.442695, %v1182_v53 }
 0x213   : > { %v2133_v46 = vpop.eup %2132  ;;  %v1327_v45 = vmul.f32 1.442695, %v1183_v62 }
 0x214   : > { %v1389_v50 = vadd.f32 %v2111_v16, %v1388_v32  ;;  %v2135_v16 = vpop.eup %2134  ;;  %2148 = vpow2.f32 %v1325_v18 }
 0x215   : > { %2150 = vpow2.f32 %v1327_v45 }
 0x216   : > { %v1390_v20 = vadd.f32 %v2113_v0, %v1389_v50  ;;  %v2137_v50 = vpop.eup %2136  ;;  %v3350_v0 = vsub.f32 %v2972_v14, %v3029_v4  ;;  %2152 = vpow2.f32 %v1329_v19  ;;  %v3353_v14 = vsub.f32 %v3007_v57, %v3029_v4 }
 0x217   : > { %v2139_v56 = vpop.eup %2138 }
 0x218   : > { %v1391_v55 = vadd.f32 %v2115_v51, %v1390_v20  ;;  %v1331_v40 = vmul.f32 1.442695, %v3350_v0  ;;  %v3351_v20 = vsub.f32 %v2986_v30, %v3029_v4  ;;  %v2141_v17 = vpop.eup %2140  ;;  %v1337_v61 = vmul.f32 1.442695, %v3353_v14 }
 0x21a   : > { %v1392_v43 = vadd.f32 %v2117_v24, %v1391_v55  ;;  %v1333_v51 = vmul.f32 1.442695, %v3351_v20  ;;  %2154 = vpow2.f32 %v1331_v40  ;;  %v2143_v24 = vpop.eup %2142 }
 0x21c   : > { %v1393_v6 = vadd.f32 %v2119_v59, %v1392_v43  ;;  %2156 = vpow2.f32 %v1333_v51  ;;  %v2145_v2 = vpop.eup %2144 }
 0x21d   : > { %2158 = vpow2.f32 %v1335_v39 }
 0x21e   : > { %v1394_v63 = vadd.f32 %v2121_v1, %v1393_v6  ;;  %v2147_v30 = vpop.eup %2146  ;;  %2160 = vpow2.f32 %v1337_v61  ;;  %v3354_v1 = vsub.f32 %v3020_v41, %v3023_v54  ;;  %v1339_v41 = vld [vmem:[#allocation3] sm:$0x1] }
 0x220   : > { %v1395_v29 = vadd.f32 %v2123_v33, %v1394_v63  ;;  %v1106_v15 = vmul.f32 1.442695, %v3354_v1 }
 0x221   : > { %v2149_v28 = vpop.eup %2148 }
 0x222   : > { %v1396_v34 = vadd.f32 %v2125_v31, %v1395_v29  ;;  %v2151_v47 = vpop.eup %2150  ;;  %2162 = vpow2.f32 %v1106_v15 }
 0x223   : > { %v2153_v9 = vpop.eup %2152 }
 0x224   : > { %v1397_v21 = vadd.f32 %v2127_v13, %v1396_v34 }
 0x226   : > { %v1398_v42 = vadd.f32 %v2129_v38, %v1397_v21  ;;  %v1427_v38 = vld [vmem:[#allocation2] sm:$0x1] }
 0x227   : > { %v2155_v5 = vpop.eup %2154 }
 0x228   : > { %v1399_v10 = vadd.f32 %v2131_v12, %v1398_v42 }
 0x229   : > { %v2157_v4 = vpop.eup %2156 }
 0x22a   : > { %v1400_v32 = vadd.f32 %v2133_v46, %v1399_v10  ;;  %v2159_v33 = vpop.eup %2158 }
 0x22b   : > { %v2161_v27 = vpop.eup %2160 }
 0x22c   : > { %v1401_v52 = vadd.f32 %v2135_v16, %v1400_v32 }
 0x22e   : > { %v1402_v60 = vadd.f32 %v2137_v50, %v1401_v52 }
 0x22f   : > { %v2163_v3 = vpop.eup %2162 }
 0x230   : > { %v1403_v49 = vadd.f32 %v2139_v56, %v1402_v60  ;;  %v1340_v34 = vmul.f32 %v2163_v3, %v1339_v41 }
 0x232   : > { %v1404_v55 = vadd.f32 %v2141_v17, %v1403_v49 }
 0x234   : > { %v1405_v58 = vadd.f32 %v2143_v24, %v1404_v55 }
 0x236   : > { %v1406_v43 = vadd.f32 %v2145_v2, %v1405_v58 }
 0x238   : > { %v1407_v59 = vadd.f32 %v2147_v30, %v1406_v43 }
 0x23a   : > { %v1408_v26 = vadd.f32 %v2149_v28, %v1407_v59 }
 0x23c   : > { %v1409_v6 = vadd.f32 %v2151_v47, %v1408_v26 }
 0x23e   : > { %v1410_v23 = vadd.f32 %v2153_v9, %v1409_v6 }
 0x240   : > { %v1411_v57 = vadd.f32 %v2155_v5, %v1410_v23 }
 0x242   : > { %v1412_v63 = vadd.f32 %v2157_v4, %v1411_v57 }
 0x244   : > { %v1413_v48 = vadd.f32 %v2159_v33, %v1412_v63 }
 0x246   : > { %v1414_v35 = vadd.f32 %v2161_v27, %v1413_v48 }
 0x248   : > { %v1415_v29 = vrot.slane %v1414_v35, 4 }
 0x24a   : > { %v1416_v31 = vadd.f32 %v1415_v29, %v1414_v35 }
 0x24c   : > { %v1417_v7 = vrot.slane %v1416_v31, 2 }
 0x24e   : > { %v1418_v44 = vadd.f32 %v1417_v7, %v1416_v31 }
 0x250   : > { %v1419_v54 = vrot.slane %v1418_v44, 1 }
 0x252   : > { %v1420_v13 = vadd.f32 %v1419_v54, %v1418_v44 }
 0x254   : > { %v1421_v37 = vadd.f32 %v1420_v13, %v1340_v34 }
 0x256   : > { %1422 = vst [vmem:[#allocation3] sm:$0x1] %v1421_v37 }
 0x25d   : > { %v1428_v53 = vld [vmem:[#allocation3] sm:$0x1] }
 0x25e   : > { %2164 = vlog2.f32 %v1428_v53 }
 0x26b   : > { %v2165_v8 = vpop.eup %2164 }
 0x26c   : > { %v1430_v21 = vmul.f32 0.6931472, %v2165_v8 }
 0x26e   : > { %v1431_v62 = vadd.f32 %v1430_v21, %v1427_v38 }
 0x270   : > { %v1433_v36 = vadd.f32 %v1432_v11, %v1431_v62 }
 0x272   : > { %1434 = vst [vmem:[%s257_s30] sm:$0x1] %v1433_v36 }
 0x273   : > { %2179 = shalt.err (!%p2176_p8)
}
 0x274   : > { %s2180_s19 = scalar_lea.hbm %s1446_s8, 16  ;;  %s2184_s23 = scalar_lea.hbm %s3262_s3, 48 }
 0x275   : > { %p2181_p10 = scmp.ne.s32.totalorder %s1446_s8, %s2180_s19  ;;  %p2185_p13 = scmp.lt.s32.totalorder %s1446_s8, %s3262_s3 }
 0x276   : > { %p2186_p0 = scmp.lt.s32.totalorder %s2184_s23, %s2180_s19 }
 0x277   : > { %p2182_p11 = pnand %p2181_p10, %p2307_p5 }
 0x278   : > { %p2187_p1 = por %p2186_p0, %p2185_p13 }
 0x279   : > { %p2183_p12 = pneg %p2182_p11 }
 0x27b   : > { %p2188_p2 = pnand %p2187_p1, %p2183_p12 }
 0x27d   : > { %2191 = shalt.err (!%p2188_p2)
}
 0x27e   : > { %1954 = dma.vmem_to_hbm [thread:$0]  (%p2307_p5), %s1449_s4, 16, %s1446_s8, %s1436_s9  }
 0x27f PF: > { %p1960_p3 = scmp.ge.s32.totalorder %s2242_s17, 2  ;;  %s1460_s28 = sand.u32 1, %s2222_s12  }
 0x280   : > { %s1461_s29 = scalar_lea.sflag [#allocation6], %s1460_s28 }
 0x281   : > { %p1957_p4 = pnand %p1960_p3, %p2318_p9 }
 0x283   : > { %p1958_p6 = pneg %p1957_p4 }
 0x285   : > { %2217 = dma.done.wait (%p1958_p6), %s1461_s29, 16  }
 0x286   : > { %2219 = vsyncadd (%p1958_p6), %s1461_s29, 4294967280  ;;  %s16_s17 = sadd.s32 1, %s2242_s17   ;;  %s3355_s12 = smov %s2226_s13 }
 0x287   : > { %p13_p7 = scmp.ge.s32.totalorder %s16_s17, 5   ;;  %s3356_s13 = smov %s2230_s14 }
 0x288   : > { %s3357_s14 = smov %s2316_s24  ;;  %s3358_s15 = smov %s2238_s16 }
 0x289   : > { %s3359_s16 = smov %s3361_s20  ;;  %15 = sbr.rel (!%p13_p7) target bundleno = 4 (0x4), region = 124 }
 0x28e   :  { %1465 = vsyncpa [#allocation6], 1 }
 0x28f   :  { %1467 = vsyncpa [#allocation6 + $0x1], 1 }

</bundles_post_ra>
